<compile_context>
chip_gen: v5e
topology: v5e:2x2
jax: 0.10.0
libtpu: 0.0.40
codegen_flags: <defaults>
</compile_context>

<pallas_src>
import functools

import jax
import jax.numpy as jnp
from jax.experimental import pallas as pl
from jax.experimental.pallas import tpu as pltpu


# ----------------------------------------------------------------------------
# Kernel
# ----------------------------------------------------------------------------
def _refine_kernel(f_ref, p_ref,
                   w1f_ref, w1p_ref, b1_ref, csum_ref,
                   w23_ref, b23_ref,
                   out_ref,
                   *, radius, eps, inv_n):
    f = f_ref[...].astype(jnp.float32)            # (tm, D)
    p = p_ref[...].astype(jnp.float32)            # (tm, 3)
    D = f.shape[-1]

    ones_col = jnp.ones((D, 1), jnp.float32)      # reduction-by-matmul column

    # ---- LayerNorm statistics over the virtual concat [f, p] -------------
    # Row sums of the D-wide part on the (otherwise idle) MXU; the 3-wide
    # position part is a trivial reduce.
    s1 = (jnp.dot(f, ones_col, preferred_element_type=jnp.float32)
          + jnp.sum(p, axis=-1, keepdims=True))                     # (tm, 1)
    mu = s1 * inv_n

    fc = f - mu                                                     # (tm, D)
    pc = p - mu                                                     # (tm, 3)
    s2 = (jnp.dot(fc * fc, ones_col, preferred_element_type=jnp.float32)
          + jnp.sum(pc * pc, axis=-1, keepdims=True))               # (tm, 1)
    inv = jax.lax.rsqrt(s2 * inv_n + eps)                           # (tm, 1)

    # ---- fc1 with centering + normalization folded in ---------------------
    #   xn @ W1_aff = inv * (x @ W1_aff - mu * colsum(W1_aff))
    acc = (jnp.dot(f, w1f_ref[...], preferred_element_type=jnp.float32)
           + jnp.dot(p, w1p_ref[...], preferred_element_type=jnp.float32))
    h1 = inv * (acc - mu * csum_ref[...]) + b1_ref[...]
    h1 = jnp.maximum(h1, 0.0)                     # relu; dropout1 = identity

    # ---- fused fc2 @ fc (no nonlinearity between), dropout2 = identity ----
    b = jnp.dot(h1, w23_ref[...], preferred_element_type=jnp.float32) + b23_ref[...]

    out_ref[...] = (p + jnp.tanh(b) * radius).astype(out_ref.dtype)


# ----------------------------------------------------------------------------
# Wrapper
# ----------------------------------------------------------------------------
def vert_pos_refinement_pallas(verts_f, verts_position, params,
                               *, radius=0.001, tm=None):
    """verts_f: (B, N, D), verts_position: (B, N, 3) -> (B, N, 3)."""
    B, N, D = verts_f.shape
    in_dim = D + 3
    hid = in_dim // 4
    M = B * N

    ln_w, ln_b, w1, b1, w2, b2, w3, b3 = params

    # --- one-time wrapper-side weight folding (exact up to f32 rounding) ---
    ln_w = ln_w.reshape(in_dim)
    ln_b = ln_b.reshape(1, in_dim)
    w1_aff = ln_w.reshape(in_dim, 1) * w1                 # LN scale into fc1
    b1_aff = b1.reshape(1, hid) + ln_b @ w1               # LN shift into fc1 bias
    w1f = w1_aff[:D]                                      # (D, hid)
    w1p = w1_aff[D:]                                      # (3, hid)
    csum = jnp.sum(w1_aff, axis=0, keepdims=True)         # (1, hid)  colsum(W1_aff)
    w23 = w2 @ w3                                         # (hid, 3)  fc2∘fc fused
    b23 = b2.reshape(1, hid) @ w3 + b3.reshape(1, 3)      # (1, 3)

    f2 = verts_f.reshape(M, D)
    p2 = verts_position.reshape(M, 3)

    # --- row-tile selection -------------------------------------------------
    if tm is None:
        tm = 4096                       # ~12.6 MiB of lane-padded double buffers
    tm = min(tm, M)
    if M >= 16 and tm >= M:
        tm = pl.cdiv(M, 2)              # keep >=2 grid steps (v7x megacore split)
    if tm != M:
        tm = max(8, (tm // 8) * 8)      # sublane-dim multiple of 8 unless full
    grid = (pl.cdiv(M, tm),)            # no padding of f2/p2; partial tail block OK

    # VMEM budget: each row tile pads its last dim to 128 lanes and is
    # double-buffered -> 3 tiles (f, p, out) * 2 bufs * tm * 128 lanes * 4 B.
    vmem_need = 3 * 2 * tm * 128 * 4 + (2 << 20)          # + weights / headroom
    vmem_limit = int(min(max(vmem_need, 32 << 20), 64 << 20))

    kernel = functools.partial(_refine_kernel, radius=float(radius), eps=1e-6,
                               inv_n=1.0 / float(in_dim))

    row_f = pl.BlockSpec((tm, D), lambda i: (i, 0))
    row_p = pl.BlockSpec((tm, 3), lambda i: (i, 0))
    full = lambda shape: pl.BlockSpec(shape, lambda i: (0, 0))

    out = pl.pallas_call(
        kernel,
        out_shape=jax.ShapeDtypeStruct((M, 3), verts_position.dtype),
        grid_spec=pl.GridSpec(
            grid=grid,
            in_specs=[
                row_f,                 # verts_f rows
                row_p,                 # verts_position rows (LN input + residual)
                full((D, hid)),        # w1f (LN-affine folded)
                full((3, hid)),        # w1p (LN-affine folded)
                full((1, hid)),        # b1  (LN-affine folded)
                full((1, hid)),        # colsum(w1_aff)
                full((hid, 3)),        # w23 = w2 @ w3
                full((1, 3)),          # b23 = b2 @ w3 + b3
            ],
            out_specs=row_p,
        ),
        compiler_params=pltpu.CompilerParams(
            dimension_semantics=("parallel",),
            vmem_limit_bytes=vmem_limit),
    )(f2, p2, w1f, w1p, b1_aff, csum, w23, b23)

    return out.reshape(B, N, 3)


# ----------------------------------------------------------------------------
# Deterministic parameter init (xavier_uniform Linear weights, zero biases,
# LayerNorm weight=1 / bias=0), matching weights_init in the PyTorch module.
# Weights stored as (fan_in, fan_out) so kernel computes x @ W (== torch x @ W.T).
# ----------------------------------------------------------------------------
def init_params(key, verts_f_dim):
    in_dim = verts_f_dim + 3
    hid = in_dim // 4

    def xavier(k, fan_in, fan_out):
        bound = jnp.sqrt(6.0 / (fan_in + fan_out))
        return jax.random.uniform(k, (fan_in, fan_out), jnp.float32,
                                  minval=-bound, maxval=bound)

    k1, k2, k3 = jax.random.split(key, 3)
    ln_w = jnp.ones((1, in_dim), jnp.float32)
    ln_b = jnp.zeros((1, in_dim), jnp.float32)
    w1 = xavier(k1, in_dim, hid)
    b1 = jnp.zeros((1, hid), jnp.float32)
    w2 = xavier(k2, hid, hid)
    b2 = jnp.zeros((1, hid), jnp.float32)
    w3 = xavier(k3, hid, 3)
    b3 = jnp.zeros((1, 3), jnp.float32)
    return (ln_w, ln_b, w1, b1, w2, b2, w3, b3)


# ----------------------------------------------------------------------------
# Pure-JAX reference (unfused) for correctness check
# ----------------------------------------------------------------------------
def reference(verts_f, verts_position, params, radius=0.001):
    ln_w, ln_b, w1, b1, w2, b2, w3, b3 = params
    x = jnp.concatenate([verts_f, verts_position], axis=-1)
    mu = jnp.mean(x, axis=-1, keepdims=True)
    var = jnp.mean((x - mu) ** 2, axis=-1, keepdims=True)
    xn = (x - mu) / jnp.sqrt(var + 1e-6) * ln_w[0] + ln_b[0]
    h1 = jnp.maximum(xn @ w1 + b1[0], 0.0)
    h2 = h1 @ w2 + b2[0]
    bias = jnp.tanh(h2 @ w3 + b3[0]) * radius
    return verts_position + bias


if __name__ == "__main__":
    key = jax.random.PRNGKey(0)
    k_f, k_p, k_w = jax.random.split(key, 3)

    B, N = 2, 256         # M = B*N = 512 rows
    verts_f_dim = 61      # in_dim = 64, hid = 16
    radius = 0.001

    verts_f = jax.random.normal(k_f, (B, N, verts_f_dim), jnp.float32)
    verts_position = jax.random.normal(k_p, (B, N, 3), jnp.float32) * 0.1

    params = init_params(k_w, verts_f_dim)

    # Default tm adapts: here it becomes 256 -> grid=(2,) so the parallel axis
    # splits across both TensorCores on v7x; at production sizes tm=4096
    # amortizes per-grid-step overhead.
    out = vert_pos_refinement_pallas(verts_f, verts_position, params,
                                     radius=radius)
    out = jax.block_until_ready(out)

    ref = reference(verts_f, verts_position, params, radius=radius)
    assert out.shape == (B, N, 3)
    assert jnp.allclose(out, ref, atol=1e-5, rtol=1e-5), "mismatch vs reference"

    print("KERNEL_OK")
</pallas_src>

<mosaic_0001>
module attributes {stable_mosaic.version = 11 : i64} {
  func.func @_refine_kernel(%arg0: i32, %arg1: memref<256x61xf32, #tpu.memory_space<vmem>>, %arg2: memref<256x3xf32, #tpu.memory_space<vmem>>, %arg3: memref<61x16xf32, #tpu.memory_space<vmem>>, %arg4: memref<3x16xf32, #tpu.memory_space<vmem>>, %arg5: memref<1x16xf32, #tpu.memory_space<vmem>>, %arg6: memref<1x16xf32, #tpu.memory_space<vmem>>, %arg7: memref<16x3xf32, #tpu.memory_space<vmem>>, %arg8: memref<1x3xf32, #tpu.memory_space<vmem>>, %arg9: memref<256x3xf32, #tpu.memory_space<vmem>>) attributes {dimension_semantics = [#tpu.dimension_semantics<parallel>], iteration_bounds = array<i64: 2>, scalar_prefetch = 0 : i64, scratch_operands = 0 : i64, tpu.core_type = #tpu.core_type<tc>, window_params = [{transform_indices = @transform_0, window_bounds = array<i64: 256, 61>}, {transform_indices = @transform_1, window_bounds = array<i64: 256, 3>}, {pipeline_mode = #tpu.pipeline_mode<synchronous>, transform_indices = @transform_2, window_bounds = array<i64: 61, 16>}, {pipeline_mode = #tpu.pipeline_mode<synchronous>, transform_indices = @transform_3, window_bounds = array<i64: 3, 16>}, {pipeline_mode = #tpu.pipeline_mode<synchronous>, transform_indices = @transform_4, window_bounds = array<i64: 1, 16>}, {pipeline_mode = #tpu.pipeline_mode<synchronous>, transform_indices = @transform_5, window_bounds = array<i64: 1, 16>}, {pipeline_mode = #tpu.pipeline_mode<synchronous>, transform_indices = @transform_6, window_bounds = array<i64: 16, 3>}, {pipeline_mode = #tpu.pipeline_mode<synchronous>, transform_indices = @transform_7, window_bounds = array<i64: 1, 3>}, {transform_indices = @transform_8, window_bounds = array<i64: 256, 3>}]} {
    %c0 = arith.constant 0 : index
    %c0_0 = arith.constant 0 : index
    %0 = vector.load %arg1[%c0, %c0_0] : memref<256x61xf32, #tpu.memory_space<vmem>>, vector<256x61xf32>
    %c0_1 = arith.constant 0 : index
    %c0_2 = arith.constant 0 : index
    %1 = vector.load %arg2[%c0_1, %c0_2] : memref<256x3xf32, #tpu.memory_space<vmem>>, vector<256x3xf32>
    %cst = arith.constant 1.000000e+00 : f32
    %2 = vector.broadcast %cst : f32 to vector<61x1xf32>
    %cst_3 = arith.constant dense<0.000000e+00> : vector<256x1xf32>
    %3 = tpu.matmul %0, %2, %cst_3 {dimension_numbers = #tpu.dot_dimension_numbers<[1], [0], [0], [1], [0, 0, 1, 1], [], []>} : vector<256x61xf32>, vector<61x1xf32>, vector<256x1xf32> -> vector<256x1xf32>
    %cst_4 = arith.constant dense<0.000000e+00> : vector<256xf32>
    %4 = vector.multi_reduction <add>, %1, %cst_4 [1] : vector<256x3xf32> to vector<256xf32>
    %5 = vector.shape_cast %4 : vector<256xf32> to vector<256x1xf32>
    %6 = arith.addf %3, %5 : vector<256x1xf32>
    %cst_5 = arith.constant 1.562500e-02 : f32
    %7 = vector.broadcast %cst_5 : f32 to vector<256x1xf32>
    %8 = arith.mulf %6, %7 : vector<256x1xf32>
    %9 = vector.broadcast %8 : vector<256x1xf32> to vector<256x61xf32>
    %10 = arith.subf %0, %9 : vector<256x61xf32>
    %11 = vector.broadcast %8 : vector<256x1xf32> to vector<256x3xf32>
    %12 = arith.subf %1, %11 : vector<256x3xf32>
    %13 = arith.mulf %10, %10 : vector<256x61xf32>
    %cst_6 = arith.constant dense<0.000000e+00> : vector<256x1xf32>
    %14 = tpu.matmul %13, %2, %cst_6 {dimension_numbers = #tpu.dot_dimension_numbers<[1], [0], [0], [1], [0, 0, 1, 1], [], []>} : vector<256x61xf32>, vector<61x1xf32>, vector<256x1xf32> -> vector<256x1xf32>
    %15 = arith.mulf %12, %12 : vector<256x3xf32>
    %cst_7 = arith.constant dense<0.000000e+00> : vector<256xf32>
    %16 = vector.multi_reduction <add>, %15, %cst_7 [1] : vector<256x3xf32> to vector<256xf32>
    %17 = vector.shape_cast %16 : vector<256xf32> to vector<256x1xf32>
    %18 = arith.addf %14, %17 : vector<256x1xf32>
    %cst_8 = arith.constant 1.562500e-02 : f32
    %19 = vector.broadcast %cst_8 : f32 to vector<256x1xf32>
    %20 = arith.mulf %18, %19 : vector<256x1xf32>
    %cst_9 = arith.constant 9.99999997E-7 : f32
    %21 = vector.broadcast %cst_9 : f32 to vector<256x1xf32>
    %22 = arith.addf %20, %21 : vector<256x1xf32>
    %23 = math.rsqrt %22 : vector<256x1xf32>
    %c0_10 = arith.constant 0 : index
    %c0_11 = arith.constant 0 : index
    %24 = vector.load %arg3[%c0_10, %c0_11] : memref<61x16xf32, #tpu.memory_space<vmem>>, vector<61x16xf32>
    %cst_12 = arith.constant dense<0.000000e+00> : vector<256x16xf32>
    %25 = tpu.matmul %0, %24, %cst_12 {dimension_numbers = #tpu.dot_dimension_numbers<[1], [0], [0], [1], [0, 0, 1, 1], [], []>} : vector<256x61xf32>, vector<61x16xf32>, vector<256x16xf32> -> vector<256x16xf32>
    %c0_13 = arith.constant 0 : index
    %c0_14 = arith.constant 0 : index
    %26 = vector.load %arg4[%c0_13, %c0_14] : memref<3x16xf32, #tpu.memory_space<vmem>>, vector<3x16xf32>
    %cst_15 = arith.constant dense<0.000000e+00> : vector<256x16xf32>
    %27 = tpu.matmul %1, %26, %cst_15 {dimension_numbers = #tpu.dot_dimension_numbers<[1], [0], [0], [1], [0, 0, 1, 1], [], []>} : vector<256x3xf32>, vector<3x16xf32>, vector<256x16xf32> -> vector<256x16xf32>
    %28 = arith.addf %25, %27 : vector<256x16xf32>
    %c0_16 = arith.constant 0 : index
    %c0_17 = arith.constant 0 : index
    %29 = vector.load %arg6[%c0_16, %c0_17] : memref<1x16xf32, #tpu.memory_space<vmem>>, vector<1x16xf32>
    %30 = vector.broadcast %8 : vector<256x1xf32> to vector<256x16xf32>
    %31 = vector.broadcast %29 : vector<1x16xf32> to vector<256x16xf32>
    %32 = arith.mulf %30, %31 : vector<256x16xf32>
    %33 = arith.subf %28, %32 : vector<256x16xf32>
    %34 = vector.broadcast %23 : vector<256x1xf32> to vector<256x16xf32>
    %35 = arith.mulf %34, %33 : vector<256x16xf32>
    %c0_18 = arith.constant 0 : index
    %c0_19 = arith.constant 0 : index
    %36 = vector.load %arg5[%c0_18, %c0_19] : memref<1x16xf32, #tpu.memory_space<vmem>>, vector<1x16xf32>
    %37 = vector.broadcast %36 : vector<1x16xf32> to vector<256x16xf32>
    %38 = arith.addf %35, %37 : vector<256x16xf32>
    %cst_20 = arith.constant 0.000000e+00 : f32
    %39 = vector.broadcast %cst_20 : f32 to vector<256x16xf32>
    %40 = arith.maximumf %38, %39 : vector<256x16xf32>
    %c0_21 = arith.constant 0 : index
    %c0_22 = arith.constant 0 : index
    %41 = vector.load %arg7[%c0_21, %c0_22] : memref<16x3xf32, #tpu.memory_space<vmem>>, vector<16x3xf32>
    %cst_23 = arith.constant dense<0.000000e+00> : vector<256x3xf32>
    %42 = tpu.matmul %40, %41, %cst_23 {dimension_numbers = #tpu.dot_dimension_numbers<[1], [0], [0], [1], [0, 0, 1, 1], [], []>} : vector<256x16xf32>, vector<16x3xf32>, vector<256x3xf32> -> vector<256x3xf32>
    %c0_24 = arith.constant 0 : index
    %c0_25 = arith.constant 0 : index
    %43 = vector.load %arg8[%c0_24, %c0_25] : memref<1x3xf32, #tpu.memory_space<vmem>>, vector<1x3xf32>
    %44 = vector.broadcast %43 : vector<1x3xf32> to vector<256x3xf32>
    %45 = arith.addf %42, %44 : vector<256x3xf32>
    %46 = math.tanh %45 : vector<256x3xf32>
    %cst_26 = arith.constant 1.000000e-03 : f32
    %47 = vector.broadcast %cst_26 : f32 to vector<256x3xf32>
    %48 = arith.mulf %46, %47 : vector<256x3xf32>
    %49 = arith.addf %1, %48 : vector<256x3xf32>
    %c0_27 = arith.constant 0 : index
    %c0_28 = arith.constant 0 : index
    %50 = vector.load %arg9[%c0_27, %c0_28] : memref<256x3xf32, #tpu.memory_space<vmem>>, vector<256x3xf32>
    tpu.vector_store %arg9[%c0_27, %c0_28], %49 {strides = array<i32>} : memref<256x3xf32, #tpu.memory_space<vmem>>, vector<256x3xf32>,
    return
  }
  func.func @transform_0(%arg0: i32) -> (i32, i32) {
    %c0_i32 = arith.constant 0 : i32
    %c0_i32_0 = arith.constant 0 : i32
    return %arg0, %c0_i32 : i32, i32
  }
  func.func @transform_1(%arg0: i32) -> (i32, i32) {
    %c0_i32 = arith.constant 0 : i32
    %c0_i32_0 = arith.constant 0 : i32
    return %arg0, %c0_i32 : i32, i32
  }
  func.func @transform_2(%arg0: i32) -> (i32, i32) {
    %c0_i32 = arith.constant 0 : i32
    %c0_i32_0 = arith.constant 0 : i32
    %c0_i32_1 = arith.constant 0 : i32
    return %c0_i32, %c0_i32_0 : i32, i32
  }
  func.func @transform_3(%arg0: i32) -> (i32, i32) {
    %c0_i32 = arith.constant 0 : i32
    %c0_i32_0 = arith.constant 0 : i32
    %c0_i32_1 = arith.constant 0 : i32
    return %c0_i32, %c0_i32_0 : i32, i32
  }
  func.func @transform_4(%arg0: i32) -> (i32, i32) {
    %c0_i32 = arith.constant 0 : i32
    %c0_i32_0 = arith.constant 0 : i32
    %c0_i32_1 = arith.constant 0 : i32
    return %c0_i32, %c0_i32_0 : i32, i32
  }
  func.func @transform_5(%arg0: i32) -> (i32, i32) {
    %c0_i32 = arith.constant 0 : i32
    %c0_i32_0 = arith.constant 0 : i32
    %c0_i32_1 = arith.constant 0 : i32
    return %c0_i32, %c0_i32_0 : i32, i32
  }
  func.func @transform_6(%arg0: i32) -> (i32, i32) {
    %c0_i32 = arith.constant 0 : i32
    %c0_i32_0 = arith.constant 0 : i32
    %c0_i32_1 = arith.constant 0 : i32
    return %c0_i32, %c0_i32_0 : i32, i32
  }
  func.func @transform_7(%arg0: i32) -> (i32, i32) {
    %c0_i32 = arith.constant 0 : i32
    %c0_i32_0 = arith.constant 0 : i32
    %c0_i32_1 = arith.constant 0 : i32
    return %c0_i32, %c0_i32_0 : i32, i32
  }
  func.func @transform_8(%arg0: i32) -> (i32, i32) {
    %c0_i32 = arith.constant 0 : i32
    %c0_i32_0 = arith.constant 0 : i32
    return %arg0, %c0_i32 : i32, i32
  }
}

</mosaic_0001>

<bundles_post_ra>
// kernel: tpu_custom_call.1
= control target key start
LH: loop header
LB: loop body
LE: loop exit
PB: predicated region body
PF: predicated region fallthrough
CT: control target
= control target key end

     0   :  { %s3252_s27 = smov 0   ;;  %s4723_s0 = inlined_call_operand.vmem [shape: f32[512,61], index: 0, kind: input, shape index: {}]   ;;  %s4724_s1 = inlined_call_operand.vmem [shape: f32[512,3], index: 1, kind: input, shape index: {}]   ;;  %s4725_s2 = inlined_call_operand.vmem [shape: f32[61,16], index: 2, kind: input, shape index: {}]   ;;  %s4726_s3 = inlined_call_operand.vmem [shape: f32[3,16], index: 3, kind: input, shape index: {}]   ;;  %s4727_s4 = inlined_call_operand.vmem [shape: f32[1,16], index: 4, kind: input, shape index: {}]   ;;  %s4728_s5 = inlined_call_operand.vmem [shape: f32[1,16], index: 5, kind: input, shape index: {}]   ;;  %s4729_s6 = inlined_call_operand.vmem [shape: f32[16,3], index: 6, kind: input, shape index: {}]   ;;  %s4730_s7 = inlined_call_operand.vmem [shape: f32[1,3], index: 7, kind: input, shape index: {}]   ;;  %s4731_s8 = inlined_call_operand.vmem [shape: f32[512,3], index: 8, kind: output, shape index: {}]  }
   0x1 LB: > { %s2793_s28 = sadd.s32 4294967295, %s3203_s27   ;;  %p2797_p0 = scmp.ge.s32.totalorder %s3203_s27, 1  ;;  %s3203_s27 = sphi %s3252_s27, %s18_s27  }
   0x2   : > { %p274_p1 = scmp.lt.s32.totalorder %s3203_s27, 3 }
   0x4   : > { %p275_p2 = pnand %p2797_p0, %p274_p1 }
   0x6   : > { %278 = sbr.rel (%p275_p2) target bundleno = 1248 (0x4e0), region = 52 }
   0xb   : > { %vm589_vm0 = vcmask 1044480   ;;  %s2798_s29 = sshll.u32 %s2793_s28, 5  ;;  %v3205_v0 = vmov 1.0   ;;  %vm395_vm1 = vcmask 23552   ;;  %vm492_vm2 = vcmask 498688  }
   0xc   : > { %2804 = vmatpush.msk.msra.mxu0 %vm589_vm0, %v3205_v0  ;;  %p314_p3 = scmp.lt.s32.totalorder %s2798_s29, 63  ;;  %2971 = vmatpush.msk.msra.mxu3 %vm589_vm0, %v3205_v0  ;;  %v1722_v63 = vld [vmem:[%s4725_s2 + $0x38] sm:$0x1f]  ;;  %vm1820_vm3 = vcmask 1042432  }
   0xd   : > { %2970 = vmatpush.msk.msra.mxu1 %vm589_vm0, %v3205_v0 }
   0xe   : > { %602 = vmatpush.msra.mxu0 %v3205_v0  ;;  %s4805_s29 = smov (!%p314_p3, %s2798_s29), 63  ;;  %2973 = vmatpush.msra.mxu3 %v3205_v0 }
   0xf   : > { %2972 = vmatpush.msra.mxu1 %v3205_v0  ;;  %s3263_s30 = sshll.u32 %s4805_s29, 3 }
  0x10   : > { %603 = vmatpush.msra.mxu0 %v3205_v0  ;;  %2975 = vmatpush.msra.mxu3 %v3205_v0  ;;  %s3269_s11 = scalar_lea.vmem %s4724_s1, %s3263_s30  ;;  %s3283_s14 = scalar_lea.vmem %s4723_s0, %s3263_s30 }
  0x11   : > { %2974 = vmatpush.msra.mxu1 %v3205_v0  ;;  %v3272_v1 = vld [vmem:[%s3269_s11] sm:$0xff]  ;;  %v3277_v3 = vld [vmem:[%s3269_s11 + $0x10] sm:$0xff]  ;;  %v3288_v5 = vld [vmem:[%s3269_s11 + $0x8] sm:$0xff]  ;;  %s4305_s26 = scalar_lea.vmem %s4731_s8, %s3263_s30 }
  0x12   : > { %604 = vmatpush.msra.mxu0 %v3205_v0  ;;  %2977 = vmatpush.msra.mxu3 %v3205_v0  ;;  %v396_v2 = vsel %vm395_vm1, %v3272_v1, 0.0  ;;  %v402_v4 = vsel %vm395_vm1, %v3277_v3, 0.0  ;;  %v3291_v6 = vld [vmem:[%s3283_s14] sm:$0xff]  ;;  %v399_v7 = vsel %vm395_vm1, %v3288_v5, 0.0  ;;  %v3298_v8 = vld [vmem:[%s3269_s11 + $0x18] sm:$0xff]  ;;  %v3304_v10 = vld [vmem:[%s3283_s14 + $0x8] sm:$0xff] }
  0x13   : > { %2976 = vmatpush.msra.mxu1 %v3205_v0  ;;  %397 = vadd.xlane.f32.xlu0 %v396_v2  ;;  %v405_v9 = vsel %vm395_vm1, %v3298_v8, 0.0  ;;  %v3309_v11 = vld [vmem:[%s3269_s11 + $0x20] sm:$0xff]  ;;  %v3314_v13 = vld [vmem:[%s3283_s14 + $0x10] sm:$0xff]  ;;  %v3319_v14 = vld [vmem:[%s3269_s11 + $0x28] sm:$0xff] }
  0x14   : > { %605 = vmatpush.msra.mxu0 %v3205_v0  ;;  %2979 = vmatpush.msra.mxu3 %v3205_v0  ;;  %4746 = vst [vmem:[#allocation2_spill] sm:$0xff] %v3309_v11  ;;  %v408_v12 = vsel %vm395_vm1, %v3309_v11, 0.0  ;;  %v411_v15 = vsel %vm395_vm1, %v3319_v14, 0.0  ;;  %v3324_v16 = vld [vmem:[%s3283_s14 + $0x18] sm:$0xff]  ;;  %v3327_v17 = vld [vmem:[%s3269_s11 + $0x30] sm:$0xff]  ;;  %v3334_v19 = vld [vmem:[%s3283_s14 + $0x20] sm:$0xff] }
  0x15   : > { %2978 = vmatpush.msra.mxu1 %v3205_v0  ;;  %403 = vadd.xlane.f32.xlu1 %v402_v4  ;;  %v414_v18 = vsel %vm395_vm1, %v3327_v17, 0.0  ;;  %v3337_v20 = vld [vmem:[%s3269_s11 + $0x38] sm:$0xff]  ;;  %v3344_v22 = vld [vmem:[%s3283_s14 + $0x28] sm:$0xff]  ;;  %v3354_v25 = vld [vmem:[%s3269_s11 + $0x40] sm:$0xff] }
  0x16   : > { %606 = vmatpush.msra.mxu0 %v3205_v0  ;;  %2981 = vmatpush.msra.mxu3 %v3205_v0  ;;  %v417_v21 = vsel %vm395_vm1, %v3337_v20, 0.0  ;;  %v3347_v23 = vld [vmem:[%s3269_s11 + $0x48] sm:$0xff]  ;;  %v420_v26 = vsel %vm395_vm1, %v3354_v25, 0.0  ;;  %v3359_v27 = vld [vmem:[%s3283_s14 + $0x30] sm:$0xff]  ;;  %v3362_v28 = vld [vmem:[%s3269_s11 + $0x58] sm:$0xff] }
  0x17   : > { %2980 = vmatpush.msra.mxu1 %v3205_v0  ;;  %409 = vadd.xlane.f32.xlu2 %v408_v12  ;;  %4747 = vst [vmem:[#allocation3_spill] sm:$0xff] %v3347_v23  ;;  %v423_v24 = vsel %vm395_vm1, %v3347_v23, 0.0  ;;  %v429_v29 = vsel %vm395_vm1, %v3362_v28, 0.0  ;;  %v3369_v30 = vld [vmem:[%s3269_s11 + $0x50] sm:$0xff]  ;;  %v3374_v32 = vld [vmem:[%s3283_s14 + $0x38] sm:$0xff]  ;;  %v3377_v33 = vld [vmem:[%s3269_s11 + $0x60] sm:$0xff] }
  0x18   : > { %607 = vmatpush.msra.mxu0 %v3205_v0  ;;  %2983 = vmatpush.msra.mxu3 %v3205_v0  ;;  %v426_v31 = vsel %vm395_vm1, %v3369_v30, 0.0  ;;  %4748 = vst [vmem:[#allocation4_spill] sm:$0xff] %v3377_v33  ;;  %v432_v34 = vsel %vm395_vm1, %v3377_v33, 0.0  ;;  %v3384_v35 = vld [vmem:[%s3283_s14 + $0xd0] sm:$0xff]  ;;  %v3387_v36 = vld [vmem:[%s3269_s11 + $0x68] sm:$0xff]  ;;  %v3394_v38 = vld [vmem:[%s3283_s14 + $0x40] sm:$0xff] }
  0x19   : > { %2982 = vmatpush.msra.mxu1 %v3205_v0  ;;  %v435_v37 = vsel %vm395_vm1, %v3387_v36, 0.0  ;;  %v3397_v39 = vld [vmem:[%s3269_s11 + $0x70] sm:$0xff]  ;;  %v3400_v40 = vld [vmem:[%s3269_s11 + $0x78] sm:$0xff]  ;;  %v3412_v44 = vld [vmem:[%s3269_s11 + $0x80] sm:$0xff] }
  0x1a   : > { %608 = vmatpush.msra.mxu0 %v3205_v0  ;;  %2985 = vmatpush.msra.mxu3 %v3205_v0  ;;  %4749 = vst [vmem:[#allocation5_spill] sm:$0xff] %v3397_v39  ;;  %v438_v41 = vsel %vm395_vm1, %v3397_v39, 0.0  ;;  %v441_v42 = vsel %vm395_vm1, %v3400_v40, 0.0  ;;  %v3409_v43 = vld [vmem:[%s3283_s14 + $0xd8] sm:$0xff]  ;;  %v444_v45 = vsel %vm395_vm1, %v3412_v44, 0.0  ;;  %v3419_v46 = vld [vmem:[%s3283_s14 + $0x48] sm:$0xff] }
  0x1b   : > { %2805 = vmatmul.msk.f32.vlgmr.msra.gmra.mxu0 %vm492_vm2, %v3291_v6  ;;  %400 = vadd.xlane.f32.xlu0 %v399_v7  ;;  %v3422_v47 = vld [vmem:[%s3269_s11 + $0x98] sm:$0xff]  ;;  %v3425_v48 = vld [vmem:[%s3269_s11 + $0x88] sm:$0xff]  ;;  %v3434_v51 = vld [vmem:[%s3283_s14 + $0xe0] sm:$0xff] }
  0x1c   : > { %2984 = vmatpush.msra.mxu1 %v3205_v0  ;;  %2831 = vmatmul.msk.f32.vlgmr.msra.gmra.mxu3 %vm492_vm2, %v3384_v35  ;;  %v453_v49 = vsel %vm395_vm1, %v3422_v47, 0.0  ;;  %v447_v50 = vsel %vm395_vm1, %v3425_v48, 0.0  ;;  %v3437_v52 = vld [vmem:[%s3269_s11 + $0xa0] sm:$0xff]  ;;  %v3444_v54 = vld [vmem:[%s3283_s14 + $0x50] sm:$0xff]  ;;  %v3454_v57 = vld [vmem:[%s3283_s14 + $0xe8] sm:$0xff] }
  0x1d   : > { %406 = vadd.xlane.f32.xlu1 %v405_v9  ;;  %v456_v53 = vsel %vm395_vm1, %v3437_v52, 0.0  ;;  %v3447_v55 = vld [vmem:[%s3269_s11 + $0x90] sm:$0xff]  ;;  %v3459_v58 = vld [vmem:[%s3283_s14 + $0x58] sm:$0xff]  ;;  %v3462_v59 = vld [vmem:[%s3269_s11 + $0xa8] sm:$0xff]  ;;  %2903 = vmatpush.msk.msrb.mxu3 %vm589_vm0, %v1722_v63 }
  0x1e   : > { %2837 = vmatpush.msk.msrb.mxu1 %vm589_vm0, %v3205_v0  ;;  %v450_v56 = vsel %vm395_vm1, %v3447_v55, 0.0  ;;  %v459_v60 = vsel %vm395_vm1, %v3462_v59, 0.0  ;;  %v3469_v61 = vld [vmem:[%s3283_s14 + $0x90] sm:$0xff]  ;;  %v3486_v2 = vld [vmem:[%s3283_s14 + $0x60] sm:$0xff]  ;;  %v1720_v4 = vld [vmem:[%s4725_s2 + $0x28] sm:$0xff] }
  0x1f   : > { %412 = vadd.xlane.f32.xlu2 %v411_v15  ;;  %v3472_v62 = vld [vmem:[%s3283_s14 + $0xf0] sm:$0xff]  ;;  %2823 = vmatmul.msk.f32.vlgmr.msra.gmra.mxu1 %vm492_vm2, %v3469_v61  ;;  %v3494_v7 = vld [vmem:[%s3283_s14 + $0x98] sm:$0xff]  ;;  %v1719_v9 = vld [vmem:[%s4725_s2 + $0x20] sm:$0xff]  ;;  %v3206_v15 = vmov 0  }
  0x20   : > { %1227 = vmatpush.msrb.mxu1 %v3205_v0  ;;  %v3500_v12 = vld [vmem:[%s3283_s14 + $0xf8] sm:$0xff]  ;;  %2998 = vset.pattern.permute.xlu0 %v3206_v15 }
  0x21   : > { %4750 = vst [vmem:[#allocation6_spill] sm:$0xff] %v3500_v12  ;;  %2997 = vset.pattern.permute.xlu2 %v3206_v15  ;;  %2999 = vset.pattern.permute.xlu1 %v3206_v15 }
  0x22   : > { %1228 = vmatpush.msrb.mxu1 %v3205_v0 }
  0x23   : > { %2806 = vmatmul.msk.f32.gmra.mxu0 %vm492_vm2, %v3304_v10  ;;  %427 = vadd.xlane.f32.xlu0 %v426_v31  ;;  %v1715_v31 = vld [vmem:[%s4725_s2] sm:$0xff] }
  0x24   : > { %1229 = vmatpush.msrb.mxu1 %v3205_v0  ;;  %2832 = vmatmul.msk.f32.gmra.mxu3 %vm492_vm2, %v3409_v43 }
  0x25   : > { %415 = vadd.xlane.f32.xlu1 %v414_v18  ;;  %v1718_v18 = vld [vmem:[%s4725_s2 + $0x18] sm:$0xff] }
  0x26   : > { %1230 = vmatpush.msrb.mxu1 %v3205_v0 }
  0x27   : > { %421 = vadd.xlane.f32.xlu2 %v420_v26  ;;  %2824 = vmatmul.msk.f32.gmra.mxu1 %vm492_vm2, %v3494_v7  ;;  %v1716_v26 = vld [vmem:[%s4725_s2 + $0x8] sm:$0xff] }
  0x28   : > { %1231 = vmatpush.msrb.mxu1 %v3205_v0 }
  0x2a   : > { %1232 = vmatpush.msrb.mxu1 %v3205_v0 }
  0x2b   : > { %2807 = vmatmul.msk.f32.gmra.mxu0 %vm492_vm2, %v3314_v13  ;;  %436 = vadd.xlane.f32.xlu0 %v435_v37  ;;  %v1723_v37 = vld [vmem:[%s4726_s3] sm:$0x7] }
  0x2c   : > { %1233 = vmatpush.msrb.mxu1 %v3205_v0  ;;  %2833 = vmatmul.msk.f32.gmra.mxu3 %vm492_vm2, %v3434_v51  ;;  %v1721_v0 = vld [vmem:[%s4725_s2 + $0x30] sm:$0xff] }
  0x2d   : > { %418 = vadd.xlane.f32.xlu1 %v417_v21  ;;  %1949 = vmatpush.msrb.mxu3 %v1721_v0  ;;  %v1717_v21 = vld [vmem:[%s4725_s2 + $0x10] sm:$0xff]  ;;  %v3560_v0 = vld [vmem:[%s3283_s14 + $0x88] sm:$0xff] }
  0x2e   : > { %2870 = vmatpush.msk.msrb.mxu0 %vm1820_vm3, %v1723_v37  ;;  %2986 = vmatpush.msk.msra.mxu2 %vm1820_vm3, %v1723_v37  ;;  %4753 = vst [vmem:[#allocation9_spill] sm:$0xff] %v3560_v0 }
  0x2f   : > { %439 = vadd.xlane.f32.xlu2 %v438_v41  ;;  %1950 = vmatpush.msrb.mxu3 %v1720_v4  ;;  %v3539_v41 = vld [vmem:[%s3283_s14 + $0xa8] sm:$0xff] }
  0x31   : > { %1951 = vmatpush.msrb.mxu3 %v1719_v9 }
  0x33   : > { %2808 = vmatmul.msk.f32.gmra.mxu0 %vm492_vm2, %v3324_v16  ;;  %445 = vadd.xlane.f32.xlu0 %v444_v45 }
  0x34   : > { %2834 = vmatmul.msk.f32.gmra.mxu3 %vm492_vm2, %v3454_v57 }
  0x35   : > { %424 = vadd.xlane.f32.xlu1 %v423_v24  ;;  %1952 = vmatpush.msrb.mxu3 %v1718_v18  ;;  %v3513_v24 = vld [vmem:[%s3283_s14 + $0x68] sm:$0xff] }
  0x37   : > { %454 = vadd.xlane.f32.xlu2 %v453_v49  ;;  %1953 = vmatpush.msrb.mxu3 %v1717_v21 }
  0x39   : > { %1954 = vmatpush.msrb.mxu3 %v1716_v26 }
  0x3b   : > { %2809 = vmatmul.msk.f32.gmra.mxu0 %vm492_vm2, %v3334_v19  ;;  %457 = vadd.xlane.f32.xlu0 %v456_v53 }
  0x3c   : > { %2835 = vmatmul.msk.f32.gmra.mxu3 %vm492_vm2, %v3472_v62 }
  0x3d   : > { %430 = vadd.xlane.f32.xlu1 %v429_v29  ;;  %v3521_v29 = vld [vmem:[%s3283_s14 + $0xa0] sm:$0xff]  ;;  %1955 = vmatpush.msrb.mxu3 %v1715_v31 }
  0x3e   : > { %2825 = vmatmul.msk.f32.gmra.mxu1 %vm492_vm2, %v3521_v29 }
  0x43   : > { %2810 = vmatmul.msk.f32.gmra.mxu0 %vm492_vm2, %v3344_v22 }
  0x44   : > { %2836 = vmatmul.msk.f32.gmra.mxu3 %vm492_vm2, %v3500_v12 }
  0x45   : > { %433 = vadd.xlane.f32.xlu1 %v432_v34  ;;  %v3531_v34 = vld [vmem:[%s3283_s14 + $0x70] sm:$0xff] }
  0x46   : > { %2826 = vmatmul.msk.f32.gmra.mxu1 %vm492_vm2, %v3539_v41 }
  0x4b   : > { %2811 = vmatmul.msk.f32.gmra.mxu0 %vm492_vm2, %v3359_v27 }
  0x4c   : > { %2904 = vmatmul.msk.f32.vlgmr.msrb.gmra.mxu3 %vm492_vm2, %v3291_v6 }
  0x4d   : > { %442 = vadd.xlane.f32.xlu1 %v441_v42  ;;  %v3546_v42 = vld [vmem:[%s3283_s14 + $0x78] sm:$0xff] }
  0x4e   : > { %4751 = vst [vmem:[#allocation7_spill] sm:$0xff] %v3546_v42 }
  0x53   : > { %2812 = vmatmul.msk.f32.gmra.mxu0 %vm492_vm2, %v3374_v32 }
  0x54   : > { %2905 = vmatmul.msk.f32.gmra.mxu3 %vm492_vm2, %v3304_v10 }
  0x55   : > { %448 = vadd.xlane.f32.xlu1 %v447_v50  ;;  %v3553_v50 = vld [vmem:[%s3283_s14 + $0x80] sm:$0xff] }
  0x56   : > { %4752 = vst [vmem:[#allocation8_spill] sm:$0xff] %v3553_v50 }
  0x5b   : > { %2813 = vmatmul.msk.f32.gmra.mxu0 %vm492_vm2, %v3394_v38 }
  0x5c   : > { %2906 = vmatmul.msk.f32.gmra.mxu3 %vm492_vm2, %v3314_v13 }
  0x5d   : > { %451 = vadd.xlane.f32.xlu1 %v450_v56 }
  0x63   : > { %2814 = vmatmul.msk.f32.gmra.mxu0 %vm492_vm2, %v3419_v46 }
  0x64   : > { %2907 = vmatmul.msk.f32.gmra.mxu3 %vm492_vm2, %v3324_v16 }
  0x65   : > { %460 = vadd.xlane.f32.xlu1 %v459_v60 }
  0x6b   : > { %2815 = vmatmul.msk.f32.gmra.mxu0 %vm492_vm2, %v3444_v54 }
  0x6c   : > { %2908 = vmatmul.msk.f32.gmra.mxu3 %vm492_vm2, %v3334_v19 }
  0x73   : > { %2816 = vmatmul.msk.f32.gmra.mxu0 %vm492_vm2, %v3459_v58 }
  0x74   : > { %2909 = vmatmul.msk.f32.gmra.mxu3 %vm492_vm2, %v3344_v22 }
  0x7b   : > { %2817 = vmatmul.msk.f32.gmra.mxu0 %vm492_vm2, %v3486_v2 }
  0x7c   : > { %2910 = vmatmul.msk.f32.gmra.mxu3 %vm492_vm2, %v3359_v27 }
  0x83   : > { %2818 = vmatmul.msk.f32.gmra.mxu0 %vm492_vm2, %v3513_v24 }
  0x84   : > { %2911 = vmatmul.msk.f32.gmra.mxu3 %vm492_vm2, %v3374_v32 }
  0x86   : > { %v398_v45 = vpop.xlane.xlu0 %397 }
  0x88   : > { %v404_v15 = vpop.xlane.xlu1 %403 }
  0x8b   : > { %2819 = vmatmul.msk.f32.gmra.mxu0 %vm492_vm2, %v3531_v34 }
  0x8c   : > { %2912 = vmatmul.msk.f32.gmra.mxu3 %vm492_vm2, %v3394_v38 }
  0x8e   : > { %v401_v60 = vpop.xlane.xlu0 %400 }
  0x90   : > { %v407_v31 = vpop.xlane.xlu1 %406 }
  0x93   : > { %2820 = vmatmul.msk.f32.gmra.mxu0 %vm492_vm2, %v3546_v42 }
  0x94   : > { %2913 = vmatmul.msk.f32.gmra.mxu3 %vm492_vm2, %v3419_v46 }
  0x98   : > { %v610_v49 = vpop.f32.mrf.mxu0 }
  0x99   : > { %v611_v53 = vadd.f32 %v610_v49, %v398_v45 }
  0x9b   : > { %v706_v56 = vmul.f32 0.015625, %v611_v53  ;;  %2821 = vmatmul.msk.f32.gmra.mxu0 %vm492_vm2, %v3553_v50  ;;  %v410_v53 = vpop.xlane.xlu2 %409 }
  0x9c   : > { %2914 = vmatmul.msk.f32.gmra.mxu3 %vm492_vm2, %v3444_v54 }
  0x9d   : > { %740 = vperm.xlu0 %2998, %v706_v56  }
  0xa0   : > { %v613_v63 = vpop.f32.mrf.mxu0 }
  0xa1   : > { %v614_v4 = vadd.f32 %v613_v63, %v401_v60 }
  0xa3   : > { %v707_v9 = vmul.f32 0.015625, %v614_v4  ;;  %2822 = vmatmul.msk.f32.gmra.mxu0 %vm492_vm2, %v3560_v0  ;;  %v413_v4 = vpop.xlane.xlu2 %412 }
  0xa4   : > { %2915 = vmatmul.msk.f32.gmra.mxu3 %vm492_vm2, %v3459_v58 }
  0xa5   : > { %745 = vperm.xlu2 %2997, %v707_v9  }
  0xa8   : > { %v616_v18 = vpop.f32.mrf.mxu0 }
  0xa9   : > { %v617_v21 = vadd.f32 %v616_v18, %v404_v15 }
  0xab   : > { %v708_v26 = vmul.f32 0.015625, %v617_v21  ;;  %2871 = vmatmul.msk.f32.vlgmr.msrb.gmra.mxu0 %vm395_vm1, %v3272_v1  ;;  %v416_v21 = vpop.xlane.xlu1 %415 }
  0xac   : > { %2916 = vmatmul.msk.f32.gmra.mxu3 %vm492_vm2, %v3486_v2 }
  0xad   : > { %750 = vperm.xlu1 %2999, %v708_v26  }
  0xb0   : > { %v619_v37 = vpop.f32.mrf.mxu0 }
  0xb1   : > { %v620_v45 = vadd.f32 %v619_v37, %v407_v31 }
  0xb3   : > { %v709_v49 = vmul.f32 0.015625, %v620_v45  ;;  %2872 = vmatmul.msk.f32.gmra.mxu0 %vm395_vm1, %v3288_v5  ;;  %v419_v45 = vpop.xlane.xlu1 %418 }
  0xb4   : > { %2917 = vmatmul.msk.f32.gmra.mxu3 %vm492_vm2, %v3513_v24 }
  0xb5   : > { %755 = vperm.xlu0 %2998, %v709_v49  }
  0xb8   : > { %v622_v56 = vpop.f32.mrf.mxu0 }
  0xb9   : > { %v623_v60 = vadd.f32 %v622_v56, %v410_v53 }
  0xbb   : > { %v710_v63 = vmul.f32 0.015625, %v623_v60  ;;  %2873 = vmatmul.msk.f32.gmra.mxu0 %vm395_vm1, %v3277_v3  ;;  %v3589_v60 = vld [vmem:[%s3283_s14 + $0xb0] sm:$0xff] }
  0xbc   : > { %2827 = vmatmul.msk.f32.gmra.mxu1 %vm492_vm2, %v3589_v60  ;;  %2918 = vmatmul.msk.f32.gmra.mxu3 %vm492_vm2, %v3531_v34 }
  0xbd   : > { %760 = vperm.xlu0 %2998, %v710_v63   ;;  %v422_v63 = vpop.xlane.xlu2 %421 }
  0xc0   : > { %v625_v9 = vpop.f32.mrf.mxu0 }
  0xc1   : > { %v626_v15 = vadd.f32 %v625_v9, %v413_v4 }
  0xc3   : > { %v711_v18 = vmul.f32 0.015625, %v626_v15  ;;  %2874 = vmatmul.msk.f32.gmra.mxu0 %vm395_vm1, %v3298_v8 }
  0xc4   : > { %2919 = vmatmul.msk.f32.gmra.mxu3 %vm492_vm2, %v3546_v42 }
  0xc5   : > { %765 = vperm.xlu2 %2997, %v711_v18   ;;  %v425_v18 = vpop.xlane.xlu1 %424 }
  0xc8   : > { %v628_v26 = vpop.f32.mrf.mxu0 }
  0xc9   : > { %v629_v31 = vadd.f32 %v628_v26, %v416_v21  ;;  %v3598_v21 = vld [vmem:[%s3283_s14 + $0xb8] sm:$0xff]  ;;  %v3600_v26 = vpop.f32.mrf.mxu3 }
  0xca   : > { %4754 = vst [vmem:[#allocation10_spill] sm:$0xff] %v3600_v26  ;;  %2828 = vmatmul.msk.f32.gmra.mxu1 %vm492_vm2, %v3598_v21 }
  0xcb   : > { %v712_v37 = vmul.f32 0.015625, %v629_v31  ;;  %2875 = vmatmul.msk.f32.gmra.mxu0 %vm395_vm1, %v3309_v11 }
  0xcc   : > { %2920 = vmatmul.msk.f32.gmra.mxu3 %vm492_vm2, %v3553_v50 }
  0xcd   : > { %770 = vperm.xlu2 %2997, %v712_v37  }
  0xd0   : > { %v631_v49 = vpop.f32.mrf.mxu0 }
  0xd1   : > { %v632_v53 = vadd.f32 %v631_v49, %v419_v45  ;;  %v431_v49 = vpop.xlane.xlu1 %430 }
  0xd3   : > { %v713_v56 = vmul.f32 0.015625, %v632_v53  ;;  %2876 = vmatmul.msk.f32.gmra.mxu0 %vm395_vm1, %v3319_v14  ;;  %v3609_v53 = vld [vmem:[%s3283_s14 + $0xc0] sm:$0xff] }
  0xd4   : > { %2829 = vmatmul.msk.f32.gmra.mxu1 %vm492_vm2, %v3609_v53  ;;  %2921 = vmatmul.msk.f32.gmra.mxu3 %vm492_vm2, %v3560_v0  ;;  %v3677_v0 = vld [vmem:[%s3269_s11 + $0xb8] sm:$0xff] }
  0xd5   : > { %775 = vperm.xlu2 %2997, %v713_v56   ;;  %v428_v56 = vpop.xlane.xlu0 %427 }
  0xd8   : > { %v634_v4 = vpop.f32.mrf.mxu0 }
  0xd9   : > { %v635_v9 = vadd.f32 %v634_v4, %v422_v63  ;;  %v3613_v63 = vpop.f32.mrf.mxu3 }
  0xda   : > { %4755 = vst [vmem:[#allocation11_spill] sm:$0xff] %v3613_v63 }
  0xdb   : > { %v714_v15 = vmul.f32 0.015625, %v635_v9  ;;  %2877 = vmatmul.msk.f32.gmra.mxu0 %vm395_vm1, %v3327_v17 }
  0xdc   : > { %2922 = vmatmul.msk.f32.gmra.mxu3 %vm492_vm2, %v3469_v61 }
  0xdd   : > { %780 = vperm.xlu1 %2999, %v714_v15   ;;  %v437_v26 = vpop.xlane.xlu0 %436 }
  0xe0   : > { %v637_v31 = vpop.f32.mrf.mxu0 }
  0xe1   : > { %v638_v37 = vadd.f32 %v637_v31, %v425_v18  ;;  %v3620_v18 = vld [vmem:[%s3283_s14 + $0xc8] sm:$0xff]  ;;  %v434_v31 = vpop.xlane.xlu1 %433 }
  0xe2   : > { %2830 = vmatmul.msk.f32.gmra.mxu1 %vm492_vm2, %v3620_v18 }
  0xe3   : > { %v715_v45 = vmul.f32 0.015625, %v638_v37  ;;  %2878 = vmatmul.msk.f32.gmra.mxu0 %vm395_vm1, %v3337_v20 }
  0xe4   : > { %2923 = vmatmul.msk.f32.gmra.mxu3 %vm492_vm2, %v3494_v7  ;;  %v3703_v7 = vld [vmem:[%s3269_s11 + $0xc8] sm:$0xff] }
  0xe5   : > { %785 = vperm.xlu0 %2998, %v715_v45   ;;  %v3626_v45 = vpop.f32.mrf.mxu3  ;;  %4762 = vst [vmem:[#allocation18_spill] sm:$0xff] %v3703_v7 }
  0xe6   : > { %4756 = vst [vmem:[#allocation12_spill] sm:$0xff] %v3626_v45 }
  0xe8   : > { %v640_v4 = vpop.f32.mrf.mxu0 }
  0xe9   : > { %v641_v9 = vadd.f32 %v640_v4, %v428_v56  ;;  %v3632_v4 = vpop.xlane.xlu1 %442 }
  0xeb   : > { %v716_v15 = vmul.f32 0.015625, %v641_v9  ;;  %2879 = vmatmul.msk.f32.gmra.mxu0 %vm395_vm1, %v3354_v25 }
  0xec   : > { %2924 = vmatmul.msk.f32.gmra.mxu3 %vm492_vm2, %v3521_v29 }
  0xed   : > { %790 = vperm.xlu0 %2998, %v716_v15   ;;  %v3634_v11 = vpop.f32.mrf.mxu3 }
  0xee   : > { %4757 = vst [vmem:[#allocation13_spill] sm:$0xff] %v3634_v11 }
  0xf0   : > { %v643_v37 = vpop.f32.mrf.mxu0 }
  0xf1   : > { %v644_v63 = vadd.f32 %v643_v37, %v431_v49  ;;  %v3638_v49 = vpop.xlane.xlu0 %445  ;;  %v3642_v45 = vpop.xlane.xlu1 %448 }
  0xf3   : > { %v717_v56 = vmul.f32 0.015625, %v644_v63  ;;  %2880 = vmatmul.msk.f32.gmra.mxu0 %vm395_vm1, %v3347_v23  ;;  %v440_v63 = vpop.xlane.xlu2 %439 }
  0xf4   : > { %2925 = vmatmul.msk.f32.gmra.mxu3 %vm492_vm2, %v3539_v41 }
  0xf5   : > { %795 = vperm.xlu2 %2997, %v717_v56  }
  0xf8   : > { %v646_v9 = vpop.f32.mrf.mxu0 }
  0xf9   : > { %v647_v15 = vadd.f32 %v646_v9, %v434_v31  ;;  %v3646_v31 = vpop.f32.mrf.mxu3  ;;  %v385_v9 = vld [vmem:[%s3269_s11 + $0xb0] sm:$0xff] }
  0xfa   : > { %4758 = vst [vmem:[#allocation14_spill] sm:$0xff] %v3646_v31  ;;  %2893 = vmatmul.msk.f32.vlgmr.msra.gmra.mxu2 %vm395_vm1, %v385_v9 }
  0xfb   : > { %v718_v12 = vmul.f32 0.015625, %v647_v15  ;;  %2881 = vmatmul.msk.f32.gmra.mxu0 %vm395_vm1, %v3369_v30  ;;  %v3649_v15 = vpop.xlane.xlu0 %457  ;;  %v3654_v11 = vpop.xlane.xlu2 %454 }
  0xfc   : > { %2926 = vmatmul.msk.f32.gmra.mxu3 %vm492_vm2, %v3589_v60 }
  0xfd   : > { %800 = vperm.xlu2 %2997, %v718_v12  }
 0x100   : > { %v649_v37 = vpop.f32.mrf.mxu0 }
 0x101   : > { %v650_v56 = vadd.f32 %v649_v37, %v437_v26 }
 0x102   : > { %2894 = vmatmul.msk.f32.gmra.mxu2 %vm395_vm1, %v3677_v0 }
 0x103   : > { %v719_v23 = vmul.f32 0.015625, %v650_v56  ;;  %2882 = vmatmul.msk.f32.gmra.mxu0 %vm395_vm1, %v3362_v28  ;;  %v3658_v56 = vpop.xlane.xlu1 %451 }
 0x104   : > { %4759 = vst [vmem:[#allocation15_spill] sm:$0xff] %v3658_v56 }
 0x105   : > { %805 = vperm.xlu0 %2998, %v719_v23   ;;  %v3660_v23 = vpop.f32.mrf.mxu3  ;;  %2927 = vmatmul.msk.f32.gmra.mxu3 %vm492_vm2, %v3598_v21 }
 0x106   : > { %4760 = vst [vmem:[#allocation16_spill] sm:$0xff] %v3660_v23 }
 0x108   : > { %v652_v12 = vpop.f32.mrf.mxu0 }
 0x109   : > { %v653_v26 = vadd.f32 %v652_v12, %v440_v63  ;;  %v3667_v12 = vpop.permute.xlu2 %745 }
 0x10b   : > { %v720_v37 = vmul.f32 0.015625, %v653_v26  ;;  %2883 = vmatmul.msk.f32.gmra.mxu0 %vm395_vm1, %v3377_v33  ;;  %v3672_v26 = vpop.xlane.xlu1 %460 }
 0x10c   : > { %4761 = vst [vmem:[#allocation17_spill] sm:$0xff] %v3672_v26  ;;  %v462_v26 = vsel %vm395_vm1, %v385_v9, 0.0 }
 0x10d   : > { %810 = vperm.xlu1 %2999, %v720_v37   ;;  %v899_v37 = vsub.f32 %v3304_v10, %v3667_v12 }
 0x10f   : > { %v741_v31 = vpop.permute.xlu0 %740 }
 0x110   : > { %v898_v50 = vsub.f32 %v3291_v6, %v741_v31  ;;  %v3665_v42 = vpop.f32.mrf.mxu0 }
 0x112   : > { %v962_v63 = vmul.f32 %v898_v50, %v898_v50  ;;  %v1957_v50 = vpop.f32.mrf.mxu3  ;;  %2928 = vmatmul.msk.f32.gmra.mxu3 %vm492_vm2, %v3609_v53 }
 0x113   : > { %2884 = vmatmul.msk.f32.gmra.mxu0 %vm395_vm1, %v3387_v36  ;;  %v963_v36 = vmul.f32 %v899_v37, %v899_v37 }
 0x114   : > { %2838 = vmatmul.msk.f32.vlgmr.msrb.gmra.mxu1 %vm492_vm2, %v962_v63  ;;  %v387_v63 = vld [vmem:[%s3269_s11 + $0xc0] sm:$0xff] }
 0x115   : > { %2895 = vmatmul.msk.f32.gmra.mxu2 %vm395_vm1, %v387_v63  ;;  %v468_v56 = vsel %vm395_vm1, %v387_v63, 0.0 }
 0x118   : > { %v3683_v6 = vpop.f32.mrf.mxu0 }
 0x11a   : > { %v1960_v37 = vpop.f32.mrf.mxu3  ;;  %2929 = vmatmul.msk.f32.gmra.mxu3 %vm492_vm2, %v3620_v18 }
 0x11b   : > { %2885 = vmatmul.msk.f32.gmra.mxu0 %vm395_vm1, %v3397_v39  ;;  %v471_v39 = vsel %vm395_vm1, %v3703_v7, 0.0 }
 0x11c   : > { %2839 = vmatmul.msk.f32.gmra.mxu1 %vm492_vm2, %v963_v36  ;;  %v930_v36 = vsub.f32 %v3272_v1, %v741_v31 }
 0x11d   : > { %2896 = vmatmul.msk.f32.gmra.mxu2 %vm395_vm1, %v3703_v7 }
 0x11f   : > { %v3691_v10 = vpop.permute.xlu1 %750 }
 0x120   : > { %v900_v61 = vsub.f32 %v3314_v13, %v3691_v10  ;;  %v3696_v23 = vpop.f32.mrf.mxu0  ;;  %v3711_v13 = vld [vmem:[%s4728_s5] ss:$0 sm:$0xff] }
 0x121   : > { %v3720_v1 = vmul.f32 %v3711_v13, %v741_v31 }
 0x122   : > { %v964_v33 = vmul.f32 %v900_v61, %v900_v61 }
 0x123   : > { %2886 = vmatmul.msk.f32.gmra.mxu0 %vm395_vm1, %v3400_v40 }
 0x124   : > { %2840 = vmatmul.msk.f32.gmra.mxu1 %vm492_vm2, %v964_v33 }
 0x126   : > { %463 = vadd.xlane.f32.xlu2 %v462_v26  ;;  %v994_v26 = vmul.f32 %v930_v36, %v930_v36  ;;  %v3737_v36 = vpop.permute.xlu2 %765 }
 0x127   : > { %v3713_v61 = vpop.permute.xlu0 %755 }
 0x128   : > { %v901_v33 = vsub.f32 %v3324_v16, %v3713_v61  ;;  %v1841_v40 = vpop.f32.mrf.mxu0  ;;  %v1963_v16 = vpop.f32.mrf.mxu3  ;;  %v933_v31 = vsub.f32 %v3298_v8, %v3713_v61  ;;  %v3746_v8 = vmul.f32 %v3711_v13, %v3667_v12  ;;  %2930 = vmatmul.msk.f32.gmra.mxu3 %vm492_vm2, %v3384_v35 }
 0x129   : > { %v3722_v9 = vadd.f32 %v1957_v50, %v1841_v40  ;;  %v1026_v50 = vsel %vm395_vm1, %v994_v26, 0.0 }
 0x12a   : > { %v965_v29 = vmul.f32 %v901_v33, %v901_v33  ;;  %v389_v33 = vld [vmem:[%s3269_s11 + $0xd0] sm:$0xff]  ;;  %v997_v26 = vmul.f32 %v933_v31, %v933_v31  ;;  %v903_v31 = vsub.f32 %v3344_v22, %v3737_v36 }
 0x12b   : > { %2887 = vmatmul.msk.f32.gmra.mxu0 %vm395_vm1, %v3412_v44  ;;  %2897 = vmatmul.msk.f32.gmra.mxu2 %vm395_vm1, %v389_v33 }
 0x12c   : > { %2841 = vmatmul.msk.f32.gmra.mxu1 %vm492_vm2, %v965_v29  ;;  %v1035_v7 = vsel %vm395_vm1, %v997_v26, 0.0 }
 0x12e   : > { %472 = vadd.xlane.f32.xlu2 %v471_v39  ;;  %v3773_v26 = vpop.permute.xlu2 %770 }
 0x12f   : > { %1027 = vadd.xlane.f32.xlu0 %v1026_v50  ;;  %v3739_v44 = vpop.permute.xlu0 %760 }
 0x130   : > { %v902_v40 = vsub.f32 %v3334_v19, %v3739_v44  ;;  %v1844_v29 = vpop.f32.mrf.mxu0  ;;  %v465_v19 = vsel %vm395_vm1, %v3677_v0, 0.0 }
 0x131   : > { %v3748_v39 = vadd.f32 %v1960_v37, %v1844_v29  ;;  %v935_v37 = vsub.f32 %v3319_v14, %v3737_v36  ;;  %v390_v29 = vld [vmem:[%s3269_s11 + $0xd8] sm:$0xff]  ;;  %v3771_v14 = vmul.f32 %v3711_v13, %v3691_v10 }
 0x132   : > { %v966_v41 = vmul.f32 %v902_v40, %v902_v40  ;;  %v1966_v40 = vpop.f32.mrf.mxu3  ;;  %v477_v21 = vsel %vm395_vm1, %v390_v29, 0.0  ;;  %2931 = vmatmul.msk.f32.gmra.mxu3 %vm492_vm2, %v3409_v43 }
 0x133   : > { %2888 = vmatmul.msk.f32.gmra.mxu0 %vm395_vm1, %v3425_v48  ;;  %v931_v48 = vsub.f32 %v3288_v5, %v3667_v12  ;;  %2898 = vmatmul.msk.f32.gmra.mxu2 %vm395_vm1, %v390_v29  ;;  %v967_v5 = vmul.f32 %v903_v31, %v903_v31  ;;  %v3820_v29 = vmul.f32 %v3711_v13, %v3739_v44 }
 0x134   : > { %2842 = vmatmul.msk.f32.gmra.mxu1 %vm492_vm2, %v966_v41 }
 0x135   : > { %v995_v12 = vmul.f32 %v931_v48, %v931_v48  ;;  %v3795_v48 = vmul.f32 %v3711_v13, %v3713_v61 }
 0x136   : > { %1036 = vadd.xlane.f32.xlu2 %v1035_v7  ;;  %v999_v7 = vmul.f32 %v935_v37, %v935_v37 }
 0x137   : > { %466 = vadd.xlane.f32.xlu1 %v465_v19  ;;  %469 = vadd.xlane.f32.xlu0 %v468_v56  ;;  %v474_v56 = vsel %vm395_vm1, %v389_v33, 0.0  ;;  %v936_v19 = vsub.f32 %v3327_v17, %v3773_v26  ;;  %v1029_v37 = vsel %vm395_vm1, %v995_v12, 0.0 }
 0x138   : > { %v1847_v63 = vpop.f32.mrf.mxu0  ;;  %v1041_v41 = vsel %vm395_vm1, %v999_v7, 0.0 }
 0x139   : > { %v3775_v22 = vadd.f32 %v1963_v16, %v1847_v63  ;;  %v904_v16 = vsub.f32 %v3359_v27, %v3773_v26  ;;  %v1000_v27 = vmul.f32 %v936_v19, %v936_v19 }
 0x13a   : > { %v1969_v31 = vpop.f32.mrf.mxu3  ;;  %2932 = vmatmul.msk.f32.gmra.mxu3 %vm492_vm2, %v3434_v51 }
 0x13b   : > { %2889 = vmatmul.msk.f32.gmra.mxu0 %vm395_vm1, %v3447_v55  ;;  %v932_v55 = vsub.f32 %v3277_v3, %v3691_v10  ;;  %v968_v63 = vmul.f32 %v904_v16, %v904_v16  ;;  %v1044_v10 = vsel %vm395_vm1, %v1000_v27, 0.0 }
 0x13c   : > { %2843 = vmatmul.msk.f32.gmra.mxu1 %vm492_vm2, %v967_v5  ;;  %v3799_v5 = vpop.permute.xlu2 %775 }
 0x13d   : > { %v996_v7 = vmul.f32 %v932_v55, %v932_v55  ;;  %v905_v61 = vsub.f32 %v3374_v32, %v3799_v5  ;;  %v937_v12 = vsub.f32 %v3337_v20, %v3799_v5  ;;  %v3824_v32 = vpop.f32.mrf.mxu1 }
 0x13e   : > { %1042 = vadd.xlane.f32.xlu2 %v1041_v41 }
 0x13f   : > { %1030 = vadd.xlane.f32.xlu1 %v1029_v37  ;;  %475 = vadd.xlane.f32.xlu0 %v474_v56  ;;  %v3816_v56 = vld [vmem:[%s3269_s11 + $0xf8] sm:$0xff]  ;;  %v969_v19 = vmul.f32 %v905_v61, %v905_v61  ;;  %v1001_v16 = vmul.f32 %v937_v12, %v937_v12 }
 0x140   : > { %v1850_v33 = vpop.f32.mrf.mxu0  ;;  %v489_v20 = vsel %vm395_vm1, %v3816_v56, 0.0 }
 0x141   : > { %v3797_v17 = vadd.f32 %v1966_v40, %v1850_v33  ;;  %v1032_v40 = vsel %vm395_vm1, %v996_v7, 0.0  ;;  %v1047_v55 = vsel %vm395_vm1, %v1001_v16, 0.0 }
 0x142   : > { %v1972_v37 = vpop.f32.mrf.mxu3  ;;  %2933 = vmatmul.msk.f32.gmra.mxu3 %vm492_vm2, %v3454_v57 }
 0x143   : > { %2890 = vmatmul.msk.f32.gmra.mxu0 %vm395_vm1, %v3422_v47 }
 0x144   : > { %2844 = vmatmul.msk.f32.gmra.mxu1 %vm492_vm2, %v968_v63  ;;  %v3844_v63 = vmul.f32 %v3711_v13, %v3737_v36 }
 0x146   : > { %1045 = vadd.xlane.f32.xlu2 %v1044_v10  ;;  %v3851_v10 = vld [vmem:[%s3269_s11 + $0xe8] sm:$0xff] }
 0x147   : > { %1033 = vadd.xlane.f32.xlu1 %v1032_v40  ;;  %478 = vadd.xlane.f32.xlu0 %v477_v21  ;;  %v667_v40 = vpop.f32.mrf.mxu1  ;;  %v483_v36 = vsel %vm395_vm1, %v3851_v10, 0.0 }
 0x148   : > { %v1853_v47 = vpop.f32.mrf.mxu0 }
 0x149   : > { %v3822_v41 = vadd.f32 %v1969_v31, %v1853_v47 }
 0x14a   : > { %v1975_v12 = vpop.f32.mrf.mxu3  ;;  %2934 = vmatmul.msk.f32.gmra.mxu3 %vm492_vm2, %v3472_v62 }
 0x14b   : > { %2891 = vmatmul.msk.f32.gmra.mxu0 %vm395_vm1, %v3437_v52 }
 0x14c   : > { %2845 = vmatmul.msk.f32.gmra.mxu1 %vm492_vm2, %v969_v19 }
 0x14e   : > { %490 = vadd.xlane.f32.xlu2 %v489_v20 }
 0x14f   : > { %v3836_v33 = vpop.permute.xlu1 %780  ;;  %v3838_v31 = vpop.permute.xlu2 %795  ;;  %1048 = vadd.xlane.f32.xlu0 %v1047_v55  ;;  %v656_v55 = vadd.f32 %v3665_v42, %v3632_v4 }
 0x150   : > { %4763 = vst [vmem:[#allocation19_spill] sm:$0xff] %v3838_v31  ;;  %v906_v27 = vsub.f32 %v3394_v38, %v3836_v33  ;;  %v1856_v52 = vpop.f32.mrf.mxu0  ;;  %v941_v21 = vsub.f32 %v3362_v28, %v3838_v31  ;;  %v938_v28 = vsub.f32 %v3354_v25, %v3836_v33  ;;  %v4780_v38 = vld [vmem:[#allocation13_spill] sm:$0xff] }
 0x151   : > { %v3846_v7 = vadd.f32 %v1972_v37, %v1856_v52  ;;  %v3871_v37 = vmul.f32 %v3711_v13, %v3773_v26  ;;  %v721_v52 = vmul.f32 0.015625, %v656_v55 }
 0x152   : > { %v970_v18 = vmul.f32 %v906_v27, %v906_v27  ;;  %v1005_v61 = vmul.f32 %v941_v21, %v941_v21  ;;  %v1002_v27 = vmul.f32 %v938_v28, %v938_v28 }
 0x153   : > { %2892 = vmatmul.msk.f32.gmra.mxu0 %vm395_vm1, %v3462_v59 }
 0x154   : > { %2846 = vmatmul.msk.f32.gmra.mxu1 %vm492_vm2, %v970_v18  ;;  %v1059_v47 = vsel %vm395_vm1, %v1005_v61, 0.0  ;;  %v1050_v21 = vsel %vm395_vm1, %v1002_v27, 0.0  ;;  %v1978_v18 = vpop.f32.mrf.mxu3  ;;  %v3889_v61 = vmul.f32 %v3711_v13, %v3799_v5 }
 0x156   : > { %1060 = vadd.xlane.f32.xlu2 %v1059_v47  ;;  %v668_v47 = vadd.f32 %v667_v40, %v3654_v11  ;;  %v659_v11 = vadd.f32 %v3683_v6, %v3638_v49 }
 0x157   : > { %484 = vadd.xlane.f32.xlu0 %v483_v36  ;;  %v3865_v59 = vpop.permute.xlu0 %785 }
 0x158   : > { %v907_v19 = vsub.f32 %v3419_v46, %v3865_v59  ;;  %v1859_v16 = vpop.f32.mrf.mxu0  ;;  %v670_v46 = vpop.f32.mrf.mxu1  ;;  %v722_v27 = vmul.f32 0.015625, %v659_v11 }
 0x159   : > { %v3873_v20 = vadd.f32 %v1975_v12, %v1859_v16  ;;  %v393_v12 = vld [vmem:[%s3269_s11 + $0xf0] sm:$0xff]  ;;  %v909_v16 = vsub.f32 %v3459_v58, %v3838_v31  ;;  %v671_v58 = vadd.f32 %v670_v46, %v3649_v15  ;;  %v662_v15 = vadd.f32 %v3696_v23, %v3642_v45  ;;  %v4765_v46 = vld [vmem:[#allocation6_spill] sm:$0xff] }
 0x15a   : > { %v971_v25 = vmul.f32 %v907_v19, %v907_v19  ;;  %v486_v19 = vsel %vm395_vm1, %v393_v12, 0.0  ;;  %2935 = vmatmul.msk.f32.gmra.mxu3 %vm492_vm2, %v4765_v46 }
 0x15b   : > { %v973_v40 = vmul.f32 %v909_v16, %v909_v16 }
 0x15c   : > { %2847 = vmatmul.msk.f32.gmra.mxu1 %vm492_vm2, %v971_v25  ;;  %v3907_v25 = vpop.permute.xlu2 %800 }
 0x15d   : > { %4764 = vst [vmem:[#allocation20_spill] sm:$0xff] %v3907_v25 }
 0x15f   : > { %1051 = vadd.xlane.f32.xlu0 %v1050_v21  ;;  %v3883_v26 = vpop.permute.xlu0 %790 }
 0x160   : > { %v908_v42 = vsub.f32 %v3444_v54, %v3883_v26  ;;  %v1862_v4 = vpop.f32.mrf.mxu0  ;;  %815 = vperm.xlu1 %2999, %v721_v52   ;;  %v725_v54 = vmul.f32 0.015625, %v668_v47  ;;  %v940_v13 = vsub.f32 %v3369_v30, %v3883_v26  ;;  %v673_v5 = vpop.f32.mrf.mxu1  ;;  %v910_v30 = vsub.f32 %v3486_v2, %v3907_v25 }
 0x161   : > { %v3891_v36 = vadd.f32 %v1978_v18, %v1862_v4  ;;  %v726_v52 = vmul.f32 0.015625, %v671_v58  ;;  %v391_v18 = vld [vmem:[%s3269_s11 + $0xe0] sm:$0xff]  ;;  %v723_v47 = vmul.f32 0.015625, %v662_v15 }
 0x162   : > { %v972_v28 = vmul.f32 %v908_v42, %v908_v42  ;;  %v1004_v55 = vmul.f32 %v940_v13, %v940_v13  ;;  %v974_v6 = vmul.f32 %v910_v30, %v910_v30  ;;  %2899 = vmatmul.msk.f32.gmra.mxu2 %vm395_vm1, %v391_v18 }
 0x164   : > { %2848 = vmatmul.msk.f32.gmra.mxu1 %vm492_vm2, %v972_v28  ;;  %v1056_v51 = vsel %vm395_vm1, %v1004_v55, 0.0 }
 0x167   : > { %487 = vadd.xlane.f32.xlu0 %v486_v19  ;;  %v4767_v19 = vld [vmem:[#allocation15_spill] sm:$0xff] }
 0x168   : > { %835 = vperm.xlu1 %2999, %v725_v54   ;;  %v3916_v49 = vpop.f32.mrf.mxu1  ;;  %v665_v45 = vadd.f32 %v3824_v32, %v4767_v19  ;;  %v4768_v54 = vld [vmem:[#allocation2_spill] sm:$0xff]  ;;  %v480_v32 = vsel %vm395_vm1, %v391_v18, 0.0 }
 0x169   : > { %v934_v16 = vsub.f32 %v4768_v54, %v3739_v44 }
 0x16a   : > { %2900 = vmatmul.msk.f32.gmra.mxu2 %vm395_vm1, %v3851_v10  ;;  %v724_v23 = vmul.f32 0.015625, %v665_v45 }
 0x16b   : > { %v998_v11 = vmul.f32 %v934_v16, %v934_v16 }
 0x16c   : > { %2849 = vmatmul.msk.f32.gmra.mxu1 %vm492_vm2, %v973_v40 }
 0x16d   : > { %v1038_v55 = vsel %vm395_vm1, %v998_v11, 0.0 }
 0x16e   : > { %820 = vperm.xlu2 %2997, %v722_v27  }
 0x16f   : > { %1057 = vadd.xlane.f32.xlu0 %v1056_v51 }
 0x170   : > { %v679_v57 = vpop.f32.mrf.mxu1 }
 0x172   : > { %2901 = vmatmul.msk.f32.gmra.mxu2 %vm395_vm1, %v393_v12  ;;  %v4770_v12 = vld [vmem:[#allocation3_spill] sm:$0xff] }
 0x173   : > { %v939_v30 = vsub.f32 %v4770_v12, %v3865_v59 }
 0x174   : > { %2850 = vmatmul.msk.f32.gmra.mxu1 %vm492_vm2, %v974_v6  ;;  %v4771_v6 = vld [vmem:[#allocation4_spill] sm:$0xff] }
 0x176   : > { %840 = vperm.xlu2 %2997, %v726_v52   ;;  %v942_v52 = vsub.f32 %v4771_v6, %v3907_v25 }
 0x177   : > { %v3921_v2 = vpop.permute.xlu0 %805 }
 0x178   : > { %v911_v21 = vsub.f32 %v3513_v24, %v3921_v2  ;;  %v682_v28 = vpop.f32.mrf.mxu1  ;;  %v1006_v18 = vmul.f32 %v942_v52, %v942_v52 }
 0x17a   : > { %v975_v42 = vmul.f32 %v911_v21, %v911_v21  ;;  %2902 = vmatmul.msk.f32.gmra.mxu2 %vm395_vm1, %v3816_v56 }
 0x17c   : > { %2851 = vmatmul.msk.f32.gmra.mxu1 %vm492_vm2, %v975_v42 }
 0x17f   : > { %v3932_v4 = vpop.permute.xlu1 %810 }
 0x180   : > { %4766 = vst [vmem:[#allocation6_spill] sm:$0xff] %v3932_v4  ;;  %v912_v62 = vsub.f32 %v3531_v34, %v3932_v4  ;;  %v4769_v34 = vld [vmem:[#allocation17_spill] sm:$0xff]  ;;  %v3945_v40 = vpop.f32.mrf.mxu1 }
 0x181   : > { %v674_v13 = vadd.f32 %v673_v5, %v4769_v34  ;;  %v1003_v5 = vmul.f32 %v939_v30, %v939_v30 }
 0x182   : > { %v976_v24 = vmul.f32 %v912_v62, %v912_v62 }
 0x183   : > { %825 = vperm.xlu0 %2998, %v723_v47   ;;  %v727_v10 = vmul.f32 0.015625, %v674_v13  ;;  %v1053_v58 = vsel %vm395_vm1, %v1003_v5, 0.0  ;;  %v1062_v47 = vsel %vm395_vm1, %v1006_v18, 0.0 }
 0x184   : > { %2852 = vmatmul.msk.f32.gmra.mxu1 %vm492_vm2, %v976_v24  ;;  %v4772_v24 = vld [vmem:[#allocation5_spill] sm:$0xff] }
 0x185   : > { %v944_v19 = vsub.f32 %v4772_v24, %v3932_v4 }
 0x187   : > { %v1008_v13 = vmul.f32 %v944_v19, %v944_v19 }
 0x18b   : > { %830 = vperm.xlu0 %2998, %v724_v23  }
 0x191   : > { %v1235_v27 = vpop.f32.mrf.mxu1 }
 0x192   : > { %1039 = vadd.xlane.f32.xlu1 %v1038_v55 }
 0x193   : > { %845 = vperm.xlu0 %2998, %v727_v10  }
 0x199   : > { %v3951_v44 = vpop.xlane.xlu2 %463  ;;  %v1238_v21 = vpop.f32.mrf.mxu1 }
 0x19a   : > { %481 = vadd.xlane.f32.xlu1 %v480_v32 }
 0x1a1   : > { %v473_v51 = vpop.xlane.xlu2 %472  ;;  %v1241_v16 = vpop.f32.mrf.mxu1 }
 0x1a2   : > { %1054 = vadd.xlane.f32.xlu1 %v1053_v58  ;;  %v1028_v56 = vpop.xlane.xlu0 %1027 }
 0x1a3   : > { %v1236_v42 = vadd.f32 %v1235_v27, %v1028_v56  ;;  %v1068_v27 = vsel %vm395_vm1, %v1008_v13, 0.0 }
 0x1a5   : > { %v1331_v15 = vmul.f32 0.015625, %v1236_v42 }
 0x1a7   : > { %v1363_v46 = vadd.f32 1e-06, %v1331_v15 }
 0x1a9   : > { %3003 = vrsqrt.f32 %v1363_v46  ;;  %v1037_v62 = vpop.xlane.xlu2 %1036  ;;  %vm1401_vm5 = vweird.f32 %v1363_v46 }
 0x1aa   : > { %v467_v45 = vpop.xlane.xlu1 %466  ;;  %1063 = vadd.xlane.f32.xlu1 %v1062_v47  ;;  %v470_v23 = vpop.xlane.xlu0 %469 }
 0x1ab   : > { %v680_v54 = vadd.f32 %v679_v57, %v467_v45  ;;  %v683_v10 = vadd.f32 %v682_v28, %v470_v23  ;;  %v1244_v57 = vpop.f32.mrf.mxu1 }
 0x1ad   : > { %v729_v34 = vmul.f32 0.015625, %v680_v54  ;;  %v730_v58 = vmul.f32 0.015625, %v683_v10 }
 0x1af   : > { %v3004_v11 = vpop.eup %3003  ;;  %855 = vperm.xlu2 %2997, %v729_v34  }
 0x1b0   : > { %v1396_v55 = vmul.f32 %v3004_v11, %v1363_v46  ;;  %vm1402_vm4 = vweird.f32 %v3004_v11  ;;  %v677_v46 = vadd.f32 %v3916_v49, %v3951_v44 }
 0x1b1   : > { %v3961_v32 = vpop.xlane.xlu2 %1042  ;;  %vm1403_vm6 = vmor %vm1401_vm5, %vm1402_vm4 }
 0x1b2   : > { %v1397_v12 = vmul.f32 %v3004_v11, %v1396_v55  ;;  %v1031_v30 = vpop.xlane.xlu1 %1030  ;;  %1069 = vadd.xlane.f32.xlu1 %v1068_v27  ;;  %v476_v5 = vpop.xlane.xlu0 %475  ;;  %v1245_v55 = vadd.f32 %v1244_v57, %v1037_v62 }
 0x1b3   : > { %v1239_v6 = vadd.f32 %v1238_v21, %v1031_v30  ;;  %v686_v21 = vadd.f32 %v3945_v40, %v473_v51  ;;  %v3967_v13 = vpop.f32.mrf.mxu1 }
 0x1b4   : > { %v1398_v52 = vmul.f32 0.5, %v1397_v12 }
 0x1b5   : > { %v1332_v56 = vmul.f32 0.015625, %v1239_v6  ;;  %v731_v30 = vmul.f32 0.015625, %v686_v21 }
 0x1b6   : > { %v1399_v42 = vsub.f32 1.5, %v1398_v52 }
 0x1b7   : > { %v1364_v15 = vadd.f32 1e-06, %v1332_v56  ;;  %860 = vperm.xlu2 %2997, %v730_v58   ;;  %v728_v56 = vmul.f32 0.015625, %v677_v46 }
 0x1b8   : > { %v1400_v47 = vmul.f32 %v3004_v11, %v1399_v42 }
 0x1b9   : > { %3005 = vrsqrt.f32 %v1364_v15  ;;  %v3964_v28 = vpop.xlane.xlu2 %1045  ;;  %vm1411_vm8 = vweird.f32 %v1364_v15 }
 0x1ba   : > { %v1034_v18 = vpop.xlane.xlu1 %1033  ;;  %v479_v19 = vpop.xlane.xlu0 %478  ;;  %v1404_v23 = vsel %vm1403_vm6, %v3004_v11, %v1400_v47  ;;  %v4773_v47 = vld [vmem:[#allocation10_spill] sm:$0xff]  ;;  %vm2387_vm6 = vcmask 130048  }
 0x1bb   : > { %v1242_v24 = vadd.f32 %v1241_v16, %v1034_v18  ;;  %v1334_v16 = vmul.f32 0.015625, %v1245_v55  ;;  %v1250_v57 = vpop.f32.mrf.mxu1  ;;  %v4774_v55 = vld [vmem:[#allocation7_spill] sm:$0xff] }
 0x1bd   : > { %v1333_v45 = vmul.f32 0.015625, %v1242_v24  ;;  %v1366_v62 = vadd.f32 1e-06, %v1334_v16  ;;  %v689_v24 = vadd.f32 %v4773_v47, %v476_v5  ;;  %v4775_v16 = vld [vmem:[#allocation8_spill] sm:$0xff] }
 0x1bf   : > { %v3006_v54 = vpop.eup %3005  ;;  %v1365_v34 = vadd.f32 1e-06, %v1333_v45  ;;  %2123 = vperm.xlu2 %2997, %v1404_v23   ;;  %v732_v45 = vmul.f32 0.015625, %v689_v24  ;;  %vm1431_vm14 = vweird.f32 %v1366_v62 }
 0x1c0   : > { %v1406_v10 = vmul.f32 %v3006_v54, %v1364_v15  ;;  %vm1412_vm7 = vweird.f32 %v3006_v54 }
 0x1c1   : > { %3007 = vrsqrt.f32 %v1365_v34  ;;  %v491_v12 = vpop.xlane.xlu2 %490  ;;  %vm1413_vm9 = vmor %vm1411_vm8, %vm1412_vm7  ;;  %vm1421_vm11 = vweird.f32 %v1365_v34 }
 0x1c2   : > { %v1407_v27 = vmul.f32 %v3006_v54, %v1406_v10  ;;  %v3971_v6 = vpop.xlane.xlu0 %1048  ;;  %3009 = vrsqrt.f32 %v1366_v62 }
 0x1c4   : > { %v1408_v58 = vmul.f32 0.5, %v1407_v27 }
 0x1c6   : > { %v1409_v11 = vsub.f32 1.5, %v1408_v58 }
 0x1c7   : > { %v3008_v40 = vpop.eup %3007  ;;  %865 = vperm.xlu2 %2997, %v731_v30  }
 0x1c8   : > { %v1416_v51 = vmul.f32 %v3008_v40, %v1365_v34  ;;  %v1410_v52 = vmul.f32 %v3006_v54, %v1409_v11  ;;  %v3010_v10 = vpop.eup %3009  ;;  %vm1422_vm10 = vweird.f32 %v3008_v40 }
 0x1c9   : > { %v3974_v49 = vpop.xlane.xlu2 %1060  ;;  %v1426_v5 = vmul.f32 %v3010_v10, %v1366_v62  ;;  %vm1423_vm12 = vmor %vm1421_vm11, %vm1422_vm10  ;;  %vm1432_vm13 = vweird.f32 %v3010_v10 }
 0x1ca   : > { %v1417_v42 = vmul.f32 %v3008_v40, %v1416_v51  ;;  %v1414_v18 = vsel %vm1413_vm9, %v3006_v54, %v1410_v52  ;;  %v3976_v23 = vpop.xlane.xlu0 %484  ;;  %v1253_v54 = vpop.f32.mrf.mxu1  ;;  %vm1433_vm15 = vmor %vm1431_vm14, %vm1432_vm13 }
 0x1cb   : > { %850 = vperm.xlu1 %2999, %v728_v56   ;;  %2128 = vperm.xlu0 %2998, %v1414_v18   ;;  %v1427_v56 = vmul.f32 %v3010_v10, %v1426_v5  ;;  %v698_v53 = vadd.f32 %v4780_v38, %v3976_v23  ;;  %v4066_v38 = vld [vmem:[%s4727_s4] ss:$0 sm:$0xff] }
 0x1cc   : > { %v1418_v44 = vmul.f32 0.5, %v1417_v42  ;;  %v4776_v42 = vld [vmem:[#allocation11_spill] sm:$0xff] }
 0x1cd   : > { %v692_v18 = vadd.f32 %v4776_v42, %v479_v19  ;;  %v4777_v19 = vld [vmem:[#allocation16_spill] sm:$0xff]  ;;  %v1251_v42 = vadd.f32 %v1250_v57, %v3961_v32  ;;  %v2381_v32 = vld [vmem:[%s4729_s6] sm:$0xff]  ;;  %v735_v50 = vmul.f32 0.015625, %v698_v53 }
 0x1ce   : > { %v1419_v15 = vsub.f32 1.5, %v1418_v44  ;;  %v1428_v44 = vmul.f32 0.5, %v1427_v56 }
 0x1d0   : > { %v1420_v46 = vmul.f32 %v3008_v40, %v1419_v15  ;;  %v1429_v15 = vsub.f32 1.5, %v1428_v44  ;;  %v2382_v44 = vld [vmem:[%s4729_s6 + $0x8] sm:$0xff] }
 0x1d1   : > { %v3982_v58 = vpop.permute.xlu2 %820  ;;  %2498 = vmatpush.msrb.mxu2 %v2382_v44 }
 0x1d2   : > { %v3978_v21 = vpop.permute.xlu1 %815  ;;  %v914_v11 = vsub.f32 %v4775_v16, %v3982_v58  ;;  %v3987_v51 = vpop.xlane.xlu0 %1051  ;;  %v1424_v52 = vsel %vm1423_vm12, %v3008_v40, %v1420_v46 }
 0x1d3   : > { %v913_v27 = vsub.f32 %v4774_v55, %v3978_v21  ;;  %870 = vperm.xlu1 %2999, %v732_v45   ;;  %v3990_v24 = vpop.f32.mrf.mxu1  ;;  %v733_v45 = vmul.f32 0.015625, %v692_v18  ;;  %v1430_v55 = vmul.f32 %v3010_v10, %v1429_v15  ;;  %2499 = vmatpush.msrb.mxu2 %v2381_v32 }
 0x1d4   : > { %v978_v47 = vmul.f32 %v914_v11, %v914_v11 }
 0x1d5   : > { %v977_v30 = vmul.f32 %v913_v27, %v913_v27  ;;  %v1434_v40 = vsel %vm1433_vm15, %v3010_v10, %v1430_v55 }
 0x1d7   : > { %2853 = vmatmul.msk.f32.gmra.mxu1 %vm492_vm2, %v977_v30  ;;  %v704_v30 = vadd.f32 %v4777_v19, %v491_v12  ;;  %v1336_v12 = vmul.f32 0.015625, %v1251_v42  ;;  %v3132_v19 = vld [vmem:[%s3283_s14 + $0x98] sm:$0xff]  ;;  %v1254_v42 = vadd.f32 %v1253_v54, %v3964_v28  ;;  %v4779_v28 = vld [vmem:[#allocation12_spill] sm:$0xff] }
 0x1d9   : > { %v737_v46 = vmul.f32 0.015625, %v704_v30  ;;  %v4022_v57 = vadd.f32 1e-06, %v1336_v12  ;;  %v1337_v32 = vmul.f32 0.015625, %v1254_v42 }
 0x1da   : > { %v3993_v34 = vpop.xlane.xlu0 %487  ;;  %v4010_v18 = vpop.permute.xlu1 %835 }
 0x1db   : > { %2133 = vperm.xlu1 %2999, %v1424_v52   ;;  %v3995_v27 = vpop.f32.mrf.mxu1  ;;  %v4778_v52 = vld [vmem:[#allocation9_spill] sm:$0xff]  ;;  %3011 = vrsqrt.f32 %v4022_v57  ;;  %v917_v30 = vsub.f32 %v3132_v19, %v4010_v18  ;;  %vm1451_vm7 = vweird.f32 %v4022_v57 }
 0x1df   : > { %2854 = vmatmul.msk.f32.gmra.mxu1 %vm492_vm2, %v978_v47 }
 0x1e2   : > { %v3998_v5 = vpop.xlane.xlu0 %1057 }
 0x1e3   : > { %875 = vperm.xlu1 %2999, %v733_v45   ;;  %v4000_v16 = vpop.f32.mrf.mxu1  ;;  %v3131_v45 = vld [vmem:[%s3283_s14 + $0x90] sm:$0xff] }
 0x1eb   : > { %2138 = vperm.xlu1 %2999, %v1434_v40   ;;  %v4008_v10 = vpop.f32.mrf.mxu1  ;;  %v4024_v40 = vpop.permute.xlu2 %840 }
 0x1f3   : > { %895 = vperm.xlu1 %2999, %v737_v46  }
 0x1f5   : > { %v4002_v11 = vpop.permute.xlu0 %825 }
 0x1f6   : > { %v915_v56 = vsub.f32 %v4778_v52, %v4002_v11  ;;  %v4030_v52 = vpop.f32.mrf.mxu1 }
 0x1f8   : > { %v979_v62 = vmul.f32 %v915_v56, %v915_v56 }
 0x1fa   : > { %2855 = vmatmul.msk.f32.gmra.mxu1 %vm492_vm2, %v979_v62  ;;  %v981_v62 = vmul.f32 %v917_v30, %v917_v30  ;;  %v4044_v30 = vadd.f32 1e-06, %v1337_v32  ;;  %v3134_v32 = vld [vmem:[%s3283_s14 + $0xa8] sm:$0xff] }
 0x1fc   : > { %vm1461_vm10 = vweird.f32 %v4044_v30 }
 0x1fd   : > { %v4012_v47 = vpop.permute.xlu0 %830 }
 0x1fe   : > { %v916_v15 = vsub.f32 %v3131_v45, %v4012_v47  ;;  %v4036_v45 = vpop.eup %3011 }
 0x1ff   : > { %v1446_v43 = vmul.f32 %v4036_v45, %v4022_v57  ;;  %vm1452_vm5 = vweird.f32 %v4036_v45 }
 0x200   : > { %v980_v55 = vmul.f32 %v916_v15, %v916_v15  ;;  %vm1453_vm8 = vmor %vm1451_vm7, %vm1452_vm5 }
 0x202   : > { %2856 = vmatmul.msk.f32.gmra.mxu1 %vm492_vm2, %v980_v55  ;;  %v3133_v55 = vld [vmem:[%s3283_s14 + $0xa0] sm:$0xff] }
 0x203   : > { %v918_v19 = vsub.f32 %v3133_v55, %v4024_v40  ;;  %v1447_v55 = vmul.f32 %v4036_v45, %v1446_v43 }
 0x205   : > { %v1040_v46 = vpop.xlane.xlu1 %1039  ;;  %v1448_v43 = vmul.f32 0.5, %v1447_v55 }
 0x206   : > { %v1248_v56 = vadd.f32 %v3967_v13, %v1040_v46  ;;  %v982_v46 = vmul.f32 %v918_v19, %v918_v19 }
 0x208   : > { %v1335_v12 = vmul.f32 0.015625, %v1248_v56  ;;  %v4046_v56 = vpop.f32.mrf.mxu1 }
 0x209   : > { %v4034_v44 = vpop.permute.xlu2 %855 }
 0x20a   : > { %v1367_v15 = vadd.f32 1e-06, %v1335_v12  ;;  %2857 = vmatmul.msk.f32.gmra.mxu1 %vm492_vm2, %v981_v62  ;;  %v4048_v62 = vpop.permute.xlu0 %845 }
 0x20b   : > { %v919_v19 = vsub.f32 %v3134_v32, %v4048_v62  ;;  %v1449_v32 = vsub.f32 1.5, %v1448_v43 }
 0x20c   : > { %3013 = vrsqrt.f32 %v1367_v15  ;;  %vm1441_vm3 = vweird.f32 %v1367_v15 }
 0x20d   : > { %v482_v13 = vpop.xlane.xlu1 %481  ;;  %3015 = vrsqrt.f32 %v4044_v30  ;;  %v983_v25 = vmul.f32 %v919_v19, %v919_v19 }
 0x20e   : > { %v695_v54 = vadd.f32 %v4779_v28, %v482_v13  ;;  %v3135_v28 = vld [vmem:[%s3269_s11 + $0x80] sm:$0xff] }
 0x210   : > { %v734_v12 = vmul.f32 0.015625, %v695_v54  ;;  %v946_v54 = vsub.f32 %v3135_v28, %v3982_v58 }
 0x211   : > { %v4050_v42 = vpop.permute.xlu2 %860 }
 0x212   : > { %v3014_v35 = vpop.eup %3013  ;;  %880 = vperm.xlu2 %2997, %v734_v12   ;;  %2858 = vmatmul.msk.f32.gmra.mxu1 %vm492_vm2, %v982_v46  ;;  %v1010_v23 = vmul.f32 %v946_v54, %v946_v54 }
 0x213   : > { %v1436_v13 = vmul.f32 %v3014_v35, %v1367_v15  ;;  %vm1442_vm0 = vweird.f32 %v3014_v35  ;;  %v3016_v31 = vpop.eup %3015 }
 0x214   : > { %v1074_v19 = vsel %vm395_vm1, %v1010_v23, 0.0  ;;  %vm1443_vm4 = vmor %vm1441_vm3, %vm1442_vm0  ;;  %vm1462_vm9 = vweird.f32 %v3016_v31 }
 0x215   : > { %v1437_v3 = vmul.f32 %v3014_v35, %v1436_v13  ;;  %v4061_v60 = vpop.xlane.xlu1 %1054  ;;  %v4781_v13 = vsub.f32 %v3722_v9, %v3720_v1  ;;  %v1456_v1 = vmul.f32 %v3016_v31, %v4044_v30  ;;  %vm1463_vm11 = vmor %vm1461_vm10, %vm1462_vm9  ;;  %v4784_v30 = vsub.f32 %v3748_v39, %v3746_v8  ;;  %v4120_v39 = vpop.f32.mrf.mxu2 }
 0x217   : > { %v1438_v4 = vmul.f32 0.5, %v1437_v3  ;;  %v4072_v3 = vpop.f32.mrf.mxu1 }
 0x219   : > { %v2124_v46 = vpop.permute.xlu2 %2123  ;;  %v1439_v12 = vsub.f32 1.5, %v1438_v4  ;;  %v3136_v4 = vld [vmem:[%s3269_s11 + $0xa0] sm:$0xff] }
 0x21a   : > { %v2281_v28 = vmul.f32 %v2124_v46, %v4781_v13  ;;  %885 = vperm.xlu2 %2997, %v735_v50   ;;  %2859 = vmatmul.msk.f32.gmra.mxu1 %vm492_vm2, %v983_v25  ;;  %v950_v54 = vsub.f32 %v3136_v4, %v4024_v40  ;;  %v1450_v25 = vmul.f32 %v4036_v45, %v1449_v32 }
 0x21b   : > { %v1440_v53 = vmul.f32 %v3014_v35, %v1439_v12  ;;  %v1457_v46 = vmul.f32 %v3016_v31, %v1456_v1  ;;  %v4782_v12 = vld [vmem:[#allocation14_spill] sm:$0xff]  ;;  %v953_v32 = vsub.f32 %v3677_v0, %v4034_v44 }
 0x21c   : > { %v2317_v55 = vadd.f32 %v4066_v38, %v2281_v28  ;;  %v1014_v43 = vmul.f32 %v950_v54, %v950_v54  ;;  %v1454_v23 = vsel %vm1453_vm8, %v4036_v45, %v1450_v25  ;;  %v701_v13 = vadd.f32 %v4782_v12, %v3993_v34  ;;  %v4783_v1 = vld [vmem:[#allocation18_spill] sm:$0xff] }
 0x21d   : > { %v4080_v9 = vpop.xlane.xlu1 %1063  ;;  %1075 = vadd.xlane.f32.xlu1 %v1074_v19  ;;  %v1444_v50 = vsel %vm1443_vm4, %v3014_v35, %v1440_v53  ;;  %v1458_v57 = vmul.f32 0.5, %v1457_v46  ;;  %v1017_v4 = vmul.f32 %v953_v32, %v953_v32 }
 0x21e   : > { %v2349_v15 = vmax.f32 %v2317_v55, 0.0  ;;  %2143 = vperm.xlu0 %2998, %v1444_v50   ;;  %v1086_v35 = vsel %vm395_vm1, %v1014_v43, 0.0  ;;  %v736_v55 = vmul.f32 0.015625, %v701_v13 }
 0x21f   : > { %v1277_v28 = vpop.f32.mrf.mxu1  ;;  %v1459_v45 = vsub.f32 1.5, %v1458_v57  ;;  %v1095_v34 = vsel %vm395_vm1, %v1017_v4, 0.0 }
 0x220   : > { %2936 = vmatmul.msk.f32.vlgmr.msrb.gmra.mxu2 %vm2387_vm6, %v2349_v15 }
 0x221   : > { %v4093_v54 = vpop.permute.xlu2 %865  ;;  %v1460_v0 = vmul.f32 %v3016_v31, %v1459_v45 }
 0x222   : > { %2148 = vperm.xlu2 %2997, %v1454_v23   ;;  %v955_v50 = vsub.f32 %v4783_v1, %v4093_v54  ;;  %v1257_v23 = vadd.f32 %v3990_v24, %v3971_v6  ;;  %v1260_v24 = vadd.f32 %v3995_v27, %v3987_v51  ;;  %v3140_v51 = vld [vmem:[%s3269_s11 + $0xa8] sm:$0xff] }
 0x223   : > { %v1464_v15 = vsel %vm1463_vm11, %v3016_v31, %v1460_v0  ;;  %v3138_v31 = vld [vmem:[%s3269_s11 + $0x68] sm:$0xff]  ;;  %v951_v27 = vsub.f32 %v3140_v51, %v4048_v62 }
 0x224   : > { %v1019_v25 = vmul.f32 %v955_v50, %v955_v50  ;;  %v1338_v13 = vmul.f32 0.015625, %v1257_v23  ;;  %v1339_v50 = vmul.f32 0.015625, %v1260_v24  ;;  %v1266_v24 = vadd.f32 %v4008_v10, %v3998_v5 }
 0x225   : > { %v1070_v53 = vpop.xlane.xlu1 %1069  ;;  %1087 = vadd.xlane.f32.xlu1 %v1086_v35  ;;  %v3137_v35 = vld [vmem:[%s3283_s14 + $0xb0] sm:$0xff]  ;;  %v1015_v23 = vmul.f32 %v951_v27, %v951_v27 }
 0x226   : > { %v4091_v19 = vadd.f32 %v1277_v28, %v1070_v53  ;;  %v1101_v43 = vsel %vm395_vm1, %v1019_v25, 0.0  ;;  %v943_v53 = vsub.f32 %v3138_v31, %v3921_v2  ;;  %v4112_v6 = vadd.f32 1e-06, %v1338_v13  ;;  %v3141_v13 = vld [vmem:[%s3283_s14 + $0xc0] sm:$0xff] }
 0x227   : > { %v1341_v51 = vmul.f32 0.015625, %v1266_v24 }
 0x228   : > { %v1007_v45 = vmul.f32 %v943_v53, %v943_v53  ;;  %3017 = vrsqrt.f32 %v4112_v6  ;;  %v1089_v53 = vsel %vm395_vm1, %v1015_v23, 0.0  ;;  %vm1471_vm13 = vweird.f32 %v4112_v6 }
 0x229   : > { %v4165_v23 = vadd.f32 1e-06, %v1341_v51 }
 0x22a   : > { %890 = vperm.xlu2 %2997, %v736_v55   ;;  %v1065_v0 = vsel %vm395_vm1, %v1007_v45, 0.0 }
 0x22b   : > { %vm1501_vm9 = vweird.f32 %v4165_v23 }
 0x22d   : > { %1096 = vadd.xlane.f32.xlu1 %v1095_v34  ;;  %v3139_v34 = vld [vmem:[%s3283_s14 + $0xb8] sm:$0xff] }
 0x22e   : > { %v921_v8 = vsub.f32 %v3139_v34, %v4034_v44 }
 0x230   : > { %v985_v25 = vmul.f32 %v921_v8, %v921_v8 }
 0x232   : > { %2153 = vperm.xlu2 %2997, %v1464_v15   ;;  %v4128_v15 = vadd.f32 1e-06, %v1339_v50  ;;  %v3143_v50 = vld [vmem:[%s3283_s14 + $0xc8] sm:$0xff] }
 0x234   : > { %3019 = vrsqrt.f32 %v4128_v15  ;;  %vm1481_vm0 = vweird.f32 %v4128_v15 }
 0x235   : > { %1102 = vadd.xlane.f32.xlu1 %v1101_v43  ;;  %v1263_v43 = vadd.f32 %v4000_v16, %v4061_v60  ;;  %v4143_v16 = vpop.f32.mrf.mxu2 }
 0x23d   : > { %v4102_v46 = vpop.permute.xlu1 %850  ;;  %v2129_v12 = vpop.permute.xlu0 %2128 }
 0x23e   : > { %v920_v32 = vsub.f32 %v3137_v35, %v4102_v46  ;;  %v2282_v28 = vmul.f32 %v2129_v12, %v4784_v30  ;;  %v4133_v12 = vpop.eup %3017  ;;  %v922_v35 = vsub.f32 %v3141_v13, %v4050_v42  ;;  %v1340_v30 = vmul.f32 0.015625, %v1263_v43  ;;  %v4167_v13 = vpop.f32.mrf.mxu2 }
 0x23f   : > { %v1466_v60 = vmul.f32 %v4133_v12, %v4112_v6  ;;  %v4155_v8 = vpop.eup %3019  ;;  %vm1472_vm12 = vweird.f32 %v4133_v12  ;;  %v3147_v6 = vld [vmem:[%s3283_s14 + $0xd8] sm:$0xff] }
 0x240   : > { %v984_v57 = vmul.f32 %v920_v32, %v920_v32  ;;  %v2318_v55 = vadd.f32 %v4066_v38, %v2282_v28  ;;  %v4785_v28 = vsub.f32 %v3775_v22, %v3771_v14  ;;  %v3142_v14 = vld [vmem:[%s3269_s11 + $0x78] sm:$0xff]  ;;  %v1476_v27 = vmul.f32 %v4155_v8, %v4128_v15  ;;  %vm1473_vm14 = vmor %vm1471_vm13, %vm1472_vm12 }
 0x241   : > { %v945_v22 = vsub.f32 %v3142_v14, %v3978_v21  ;;  %v1467_v34 = vmul.f32 %v4133_v12, %v1466_v60  ;;  %vm1482_vm15 = vweird.f32 %v4155_v8 }
 0x242   : > { %v2350_v4 = vmax.f32 %v2318_v55, 0.0  ;;  %2860 = vmatmul.msk.f32.gmra.mxu1 %vm492_vm2, %v984_v57  ;;  %v986_v57 = vmul.f32 %v922_v35, %v922_v35  ;;  %v1269_v35 = vadd.f32 %v4030_v52, %v3974_v49  ;;  %v4786_v52 = vsub.f32 %v3797_v17, %v3795_v48  ;;  %vm1483_vm3 = vmor %vm1481_vm0, %vm1482_vm15 }
 0x243   : > { %v1009_v10 = vmul.f32 %v945_v22, %v945_v22 }
 0x244   : > { %2937 = vmatmul.msk.f32.gmra.mxu2 %vm2387_vm6, %v2350_v4  ;;  %v4149_v4 = vadd.f32 1e-06, %v1340_v30  ;;  %v3144_v30 = vld [vmem:[%s3269_s11 + $0x88] sm:$0xff]  ;;  %v1342_v49 = vmul.f32 0.015625, %v1269_v35 }
 0x245   : > { %v4122_v1 = vpop.permute.xlu1 %870 }
 0x246   : > { %3021 = vrsqrt.f32 %v4149_v4  ;;  %v4192_v48 = vadd.f32 1e-06, %v1342_v49  ;;  %v1272_v49 = vadd.f32 %v4046_v56, %v4080_v9  ;;  %vm1491_vm5 = vweird.f32 %v4149_v4 }
 0x247   : > { %3023 = vrsqrt.f32 %v4165_v23 }
 0x248   : > { %1066 = vadd.xlane.f32.xlu0 %v1065_v0  ;;  %v923_v0 = vsub.f32 %v3143_v50, %v4093_v54  ;;  %3025 = vrsqrt.f32 %v4192_v48  ;;  %v1343_v15 = vmul.f32 0.015625, %v1272_v49  ;;  %vm1511_vm12 = vweird.f32 %v4192_v48 }
 0x24a   : > { %2861 = vmatmul.msk.f32.gmra.mxu1 %vm492_vm2, %v985_v25  ;;  %v1468_v25 = vmul.f32 0.5, %v1467_v34  ;;  %v987_v43 = vmul.f32 %v923_v0, %v923_v0 }
 0x24c   : > { %v1469_v60 = vsub.f32 1.5, %v1468_v25  ;;  %v3146_v25 = vld [vmem:[%s3269_s11 + $0x90] sm:$0xff] }
 0x24d   : > { %v2134_v32 = vpop.permute.xlu1 %2133 }
 0x24e   : > { %v2283_v31 = vmul.f32 %v2134_v32, %v4785_v28  ;;  %v1071_v32 = vsel %vm395_vm1, %v1009_v10, 0.0  ;;  %v947_v28 = vsub.f32 %v3144_v30, %v4002_v11  ;;  %v1470_v50 = vmul.f32 %v4133_v12, %v1469_v60  ;;  %v4189_v10 = vpop.f32.mrf.mxu2 }
 0x250   : > { %v2319_v55 = vadd.f32 %v4066_v38, %v2283_v31  ;;  %1090 = vadd.xlane.f32.xlu0 %v1089_v53  ;;  %v1477_v31 = vmul.f32 %v4155_v8, %v1476_v27  ;;  %v4176_v53 = vpop.eup %3021  ;;  %v1011_v14 = vmul.f32 %v947_v28, %v947_v28  ;;  %v1474_v30 = vsel %vm1473_vm14, %v4133_v12, %v1470_v50 }
 0x251   : > { %v1486_v34 = vmul.f32 %v4176_v53, %v4149_v4  ;;  %v4198_v35 = vpop.eup %3023  ;;  %vm1492_vm4 = vweird.f32 %v4176_v53  ;;  %v3151_v4 = vld [vmem:[%s3283_s14 + $0xe8] sm:$0xff] }
 0x252   : > { %v2351_v45 = vmax.f32 %v2319_v55, 0.0  ;;  %2862 = vmatmul.msk.f32.gmra.mxu1 %vm492_vm2, %v986_v57  ;;  %v3145_v57 = vld [vmem:[%s3283_s14 + $0xd0] sm:$0xff]  ;;  %v1478_v22 = vmul.f32 0.5, %v1477_v31  ;;  %v1077_v27 = vsel %vm395_vm1, %v1011_v14, 0.0  ;;  %v1496_v60 = vmul.f32 %v4198_v35, %v4165_v23  ;;  %v3026_v56 = vpop.eup %3025  ;;  %vm1493_vm7 = vmor %vm1491_vm5, %vm1492_vm4 }
 0x253   : > { %v924_v55 = vsub.f32 %v3145_v57, %v4122_v1  ;;  %vm1502_vm8 = vweird.f32 %v4198_v35  ;;  %vm1512_vm11 = vweird.f32 %v3026_v56 }
 0x254   : > { %2938 = vmatmul.msk.f32.gmra.mxu2 %vm2387_vm6, %v2351_v45  ;;  %v1479_v28 = vsub.f32 1.5, %v1478_v22  ;;  %v3148_v22 = vld [vmem:[%s3269_s11 + $0x98] sm:$0xff]  ;;  %vm1503_vm10 = vmor %vm1501_vm9, %vm1502_vm8 }
 0x255   : > { %v4160_v5 = vpop.permute.xlu1 %875  ;;  %v988_v0 = vmul.f32 %v924_v55, %v924_v55  ;;  %vm1513_vm13 = vmor %vm1511_vm12, %vm1512_vm11 }
 0x256   : > { %v925_v31 = vsub.f32 %v3147_v6, %v4160_v5  ;;  %v3150_v6 = vld [vmem:[%s3269_s11 + $0xb0] sm:$0xff] }
 0x258   : > { %v989_v12 = vmul.f32 %v925_v31, %v925_v31  ;;  %v952_v31 = vsub.f32 %v3150_v6, %v4102_v46 }
 0x25a   : > { %2863 = vmatmul.msk.f32.gmra.mxu1 %vm492_vm2, %v987_v43  ;;  %v948_v43 = vsub.f32 %v3146_v25, %v4012_v47 }
 0x25b   : > { %1072 = vadd.xlane.f32.xlu2 %v1071_v32  ;;  %v1487_v32 = vmul.f32 %v4176_v53, %v1486_v34  ;;  %v949_v34 = vsub.f32 %v3148_v22, %v4010_v18 }
 0x25c   : > { %v1012_v57 = vmul.f32 %v948_v43, %v948_v43  ;;  %v1506_v43 = vmul.f32 %v3026_v56, %v4192_v48  ;;  %v3153_v48 = vld [vmem:[%s3283_s14 + $0xf8] sm:$0xff] }
 0x25d   : > { %v2139_v24 = vpop.permute.xlu1 %2138  ;;  %v1488_v55 = vmul.f32 0.5, %v1487_v32  ;;  %v1013_v25 = vmul.f32 %v949_v34, %v949_v34 }
 0x25e   : > { %v2284_v45 = vmul.f32 %v2139_v24, %v4786_v52  ;;  %v1480_v24 = vmul.f32 %v4155_v8, %v1479_v28  ;;  %v4212_v52 = vpop.f32.mrf.mxu2  ;;  %v1080_v14 = vsel %vm395_vm1, %v1012_v57, 0.0 }
 0x25f   : > { %v1083_v28 = vsel %vm395_vm1, %v1013_v25, 0.0 }
 0x260   : > { %v2320_v51 = vadd.f32 %v4066_v38, %v2284_v45  ;;  %v1497_v45 = vmul.f32 %v4198_v35, %v1496_v60  ;;  %v1484_v50 = vsel %vm1483_vm3, %v4155_v8, %v1480_v24  ;;  %v4228_v8 = vadd.f32 1e-06, %v1343_v15 }
 0x261   : > { %v1507_v60 = vmul.f32 %v3026_v56, %v1506_v43 }
 0x262   : > { %v2352_v17 = vmax.f32 %v2320_v51, 0.0  ;;  %2864 = vmatmul.msk.f32.gmra.mxu1 %vm492_vm2, %v988_v0  ;;  %v1489_v0 = vsub.f32 1.5, %v1488_v55  ;;  %v3149_v51 = vld [vmem:[%s3283_s14 + $0xe0] sm:$0xff]  ;;  %3027 = vrsqrt.f32 %v4228_v8  ;;  %vm1521_vm15 = vweird.f32 %v4228_v8 }
 0x263   : > { %1078 = vadd.xlane.f32.xlu2 %v1077_v27  ;;  %v1498_v27 = vmul.f32 0.5, %v1497_v45  ;;  %v1016_v45 = vmul.f32 %v952_v31, %v952_v31 }
 0x264   : > { %2158 = vperm.xlu0 %2998, %v1474_v30   ;;  %2939 = vmatmul.msk.f32.gmra.mxu2 %vm2387_vm6, %v2352_v17  ;;  %v1490_v30 = vmul.f32 %v4176_v53, %v1489_v0 }
 0x265   : > { %v1499_v24 = vsub.f32 1.5, %v1498_v27  ;;  %v4251_v27 = vpop.f32.mrf.mxu1 }
 0x266   : > { %v4235_v57 = vpop.f32.mrf.mxu2  ;;  %v1494_v55 = vsel %vm1493_vm7, %v4176_v53, %v1490_v30  ;;  %v1092_v53 = vsel %vm395_vm1, %v1016_v45, 0.0 }
 0x267   : > { %v1500_v34 = vmul.f32 %v4198_v35, %v1499_v24  ;;  %v4261_v24 = vpop.permute.xlu1 %895 }
 0x269   : > { %v1504_v0 = vsel %vm1503_vm10, %v4198_v35, %v1500_v34  ;;  %v3152_v35 = vld [vmem:[%s3283_s14 + $0xf0] sm:$0xff] }
 0x26a   : > { %2865 = vmatmul.msk.f32.gmra.mxu1 %vm492_vm2, %v989_v12 }
 0x26b   : > { %1081 = vadd.xlane.f32.xlu2 %v1080_v14  ;;  %v1508_v14 = vmul.f32 0.5, %v1507_v60 }
 0x26c   : > { %v4221_v9 = vpop.permute.xlu2 %880  ;;  %2163 = vperm.xlu0 %2998, %v1484_v50   ;;  %v3028_v50 = vpop.eup %3027 }
 0x26d   : > { %4787 = vst [vmem:[#allocation15_spill] sm:$0xff] %v4221_v9  ;;  %v926_v17 = vsub.f32 %v3149_v51, %v4221_v9  ;;  %v1509_v15 = vsub.f32 1.5, %v1508_v14  ;;  %v1516_v25 = vmul.f32 %v3028_v50, %v4228_v8  ;;  %v1283_v60 = vpop.f32.mrf.mxu1  ;;  %vm1522_vm14 = vweird.f32 %v3028_v50 }
 0x26e   : > { %vm1523_vm0 = vmor %vm1521_vm15, %vm1522_vm14 }
 0x26f   : > { %v990_v32 = vmul.f32 %v926_v17, %v926_v17  ;;  %v4249_v17 = vpop.f32.mrf.mxu2  ;;  %v1510_v23 = vmul.f32 %v3026_v56, %v1509_v15  ;;  %v1517_v43 = vmul.f32 %v3028_v50, %v1516_v25  ;;  %v4791_v15 = vsub.f32 %v3822_v41, %v3820_v29 }
 0x271   : > { %v1518_v6 = vmul.f32 0.5, %v1517_v43 }
 0x272   : > { %2866 = vmatmul.msk.f32.gmra.mxu1 %vm492_vm2, %v990_v32  ;;  %v1514_v32 = vsel %vm1513_vm13, %v3026_v56, %v1510_v23 }
 0x273   : > { %1084 = vadd.xlane.f32.xlu2 %v1083_v28 }
 0x274   : > { %v4238_v12 = vpop.permute.xlu2 %885  ;;  %2168 = vperm.xlu0 %2998, %v1494_v55  }
 0x275   : > { %4788 = vst [vmem:[#allocation2_spill] sm:$0xff] %v4238_v12  ;;  %v927_v49 = vsub.f32 %v3151_v4, %v4238_v12  ;;  %v1519_v4 = vsub.f32 1.5, %v1518_v6 }
 0x277   : > { %v991_v22 = vmul.f32 %v927_v49, %v927_v49  ;;  %v4259_v31 = vpop.f32.mrf.mxu2  ;;  %v929_v49 = vsub.f32 %v3153_v48, %v4261_v24  ;;  %v1520_v56 = vmul.f32 %v3028_v50, %v1519_v4  ;;  %v4266_v14 = vpop.f32.mrf.mxu1  ;;  %v4794_v48 = vsub.f32 %v3873_v20, %v3871_v37 }
 0x278   : > { %4789 = vst [vmem:[#allocation17_spill] sm:$0xff] %v4259_v31 }
 0x279   : > { %v993_v45 = vmul.f32 %v929_v49, %v929_v49  ;;  %v1524_v23 = vsel %vm1523_vm0, %v3028_v50, %v1520_v56 }
 0x27a   : > { %2867 = vmatmul.msk.f32.gmra.mxu1 %vm492_vm2, %v991_v22 }
 0x27b   : > { %1093 = vadd.xlane.f32.xlu2 %v1092_v53 }
 0x27c   : > { %v2149_v51 = vpop.permute.xlu2 %2148  ;;  %2173 = vperm.xlu0 %2998, %v1504_v0  }
 0x27f   : > { %v4269_v53 = vpop.f32.mrf.mxu2  ;;  %v4281_v41 = vpop.f32.mrf.mxu1 }
 0x280   : > { %4790 = vst [vmem:[#allocation3_spill] sm:$0xff] %v4269_v53 }
 0x284   : > { %v4255_v30 = vpop.permute.xlu2 %890  ;;  %2178 = vperm.xlu0 %2998, %v1514_v32  }
 0x285   : > { %v928_v28 = vsub.f32 %v3152_v35, %v4255_v30  ;;  %v4792_v35 = vsub.f32 %v3846_v7, %v3844_v63 }
 0x287   : > { %v992_v55 = vmul.f32 %v928_v28, %v928_v28  ;;  %v2286_v28 = vmul.f32 %v2149_v51, %v4792_v35  ;;  %v4292_v51 = vld [vmem:[%s4730_s7] ss:$0 sm:$0xff] }
 0x288   : > { %v3154_v35 = vld [vmem:[%s3269_s11] sm:$0xff] }
 0x289   : > { %2868 = vmatmul.msk.f32.gmra.mxu1 %vm492_vm2, %v992_v55  ;;  %v2322_v29 = vadd.f32 %v4066_v38, %v2286_v28  ;;  %v4283_v55 = vpop.f32.mrf.mxu2 }
 0x28a   : > { %4793 = vst [vmem:[#allocation4_spill] sm:$0xff] %v4283_v55 }
 0x28b   : > { %v2354_v4 = vmax.f32 %v2322_v29, 0.0 }
 0x290   : > { %v1076_v22 = vpop.xlane.xlu1 %1075  ;;  %v2144_v34 = vpop.permute.xlu0 %2143 }
 0x291   : > { %v1284_v0 = vadd.f32 %v1283_v60, %v1076_v22  ;;  %v2285_v25 = vmul.f32 %v2144_v34, %v4791_v15  ;;  %2869 = vmatmul.msk.f32.gmra.mxu1 %vm492_vm2, %v993_v45  ;;  %v2154_v60 = vpop.permute.xlu2 %2153  ;;  %v4295_v22 = vpop.f32.mrf.mxu1 }
 0x292   : > { %v2287_v49 = vmul.f32 %v2154_v60, %v4794_v48 }
 0x293   : > { %v1347_v43 = vmul.f32 0.015625, %v1284_v0  ;;  %v2321_v32 = vadd.f32 %v4066_v38, %v2285_v25  ;;  %2183 = vperm.xlu2 %2997, %v1524_v23  }
 0x294   : > { %v2323_v56 = vadd.f32 %v4066_v38, %v2287_v49 }
 0x295   : > { %v1379_v8 = vadd.f32 1e-06, %v1347_v43  ;;  %v2353_v6 = vmax.f32 %v2321_v32, 0.0 }
 0x296   : > { %v2355_v0 = vmax.f32 %v2323_v56, 0.0 }
 0x297   : > { %3029 = vrsqrt.f32 %v1379_v8  ;;  %2940 = vmatmul.msk.f32.gmra.mxu2 %vm2387_vm6, %v2353_v6  ;;  %vm1561_vm3 = vweird.f32 %v1379_v8 }
 0x299   : > { %v4299_v43 = vpop.f32.mrf.mxu1 }
 0x29d   : > { %v3030_v50 = vpop.eup %3029 }
 0x29e   : > { %v1556_v63 = vmul.f32 %v3030_v50, %v1379_v8  ;;  %vm1562_vm2 = vweird.f32 %v3030_v50  ;;  %v1345_v8 = vmul.f32 0.015625, %v4091_v19 }
 0x29f   : > { %2941 = vmatmul.msk.f32.gmra.mxu2 %vm2387_vm6, %v2354_v4  ;;  %vm1563_vm4 = vmor %vm1561_vm3, %vm1562_vm2 }
 0x2a0   : > { %v1557_v7 = vmul.f32 %v3030_v50, %v1556_v63  ;;  %v4311_v29 = vadd.f32 1e-06, %v1345_v8 }
 0x2a1   : > { %v1298_v6 = vpop.f32.mrf.mxu1 }
 0x2a2   : > { %v1558_v45 = vmul.f32 0.5, %v1557_v7  ;;  %vm1541_vm10 = vweird.f32 %v4311_v29 }
 0x2a3   : > { %v2501_v34 = vpop.f32.mrf.mxu2 }
 0x2a4   : > { %v2502_v37 = vadd.f32 %v4292_v51, %v2501_v34  ;;  %v1559_v20 = vsub.f32 1.5, %v1558_v45 }
 0x2a6   : > { %3031 = vtanh.f32 %v2502_v37  ;;  %v1560_v15 = vmul.f32 %v3030_v50, %v1559_v20  ;;  %v1981_v37 = vpop.f32.mrf.mxu3  ;;  %v3155_v20 = vld [vmem:[%s3269_s11 + $0xd0] sm:$0xff] }
 0x2a7   : > { %2942 = vmatmul.msk.f32.gmra.mxu2 %vm2387_vm6, %v2355_v0  ;;  %3033 = vrsqrt.f32 %v4311_v29  ;;  %v956_v0 = vsub.f32 %v3155_v20, %v4122_v1 }
 0x2a8   : > { %v1564_v25 = vsel %vm1563_vm4, %v3030_v50, %v1560_v15  ;;  %v1865_v15 = vpop.f32.mrf.mxu0 }
 0x2a9   : > { %2203 = vperm.xlu2 %2997, %v1564_v25   ;;  %v1020_v8 = vmul.f32 %v956_v0, %v956_v0 }
 0x2ac   : > { %v3032_v23 = vpop.eup %3031 }
 0x2ad   : > { %v2629_v32 = vmul.f32 0.001, %v3032_v23  ;;  %v4317_v7 = vpop.eup %3033 }
 0x2ae   : > { %v1536_v19 = vmul.f32 %v4317_v7, %v4311_v29  ;;  %vm1542_vm9 = vweird.f32 %v4317_v7 }
 0x2af   : > { %v2661_v28 = vadd.f32 %v3154_v35, %v2629_v32  ;;  %v4329_v35 = vpop.xlane.xlu1 %1087  ;;  %vm1543_vm11 = vmor %vm1541_vm10, %vm1542_vm9 }
 0x2b0   : > { %v1537_v32 = vmul.f32 %v4317_v7, %v1536_v19  ;;  %v3156_v19 = vld [vmem:[%s3269_s11 + $0xe0] sm:$0xff] }
 0x2b1   : > { %2693 = vst.msk [vmem:[%s4305_s26] sm:$0xff] %vm395_vm1, %v2661_v28  ;;  %v958_v31 = vsub.f32 %v3156_v19, %v4221_v9  ;;  %v1982_v19 = vadd.f32 %v1981_v37, %v1865_v15 }
 0x2bb   : > { %v1067_v60 = vpop.xlane.xlu0 %1066 }
 0x2bc   : > { %v1275_v50 = vadd.f32 %v4072_v3, %v1067_v60 }
 0x2be   : > { %v1344_v4 = vmul.f32 0.015625, %v1275_v50  ;;  %v1538_v50 = vmul.f32 0.5, %v1537_v32 }
 0x2bf   : > { %v4315_v48 = vpop.f32.mrf.mxu1 }
 0x2c0   : > { %v1376_v49 = vadd.f32 1e-06, %v1344_v4 }
 0x2c2   : > { %3035 = vrsqrt.f32 %v1376_v49  ;;  %vm1531_vm7 = vweird.f32 %v1376_v49 }
 0x2c3   : > { %v1091_v63 = vpop.xlane.xlu0 %1090 }
 0x2c4   : > { %v4319_v56 = vadd.f32 %v1298_v6, %v1091_v63 }
 0x2c7   : > { %v2504_v45 = vpop.f32.mrf.mxu2  ;;  %v4326_v23 = vpop.f32.mrf.mxu1 }
 0x2c8   : > { %v3036_v34 = vpop.eup %3035  ;;  %v2505_v3 = vadd.f32 %v4292_v51, %v2504_v45  ;;  %v1104_v45 = vsel %vm395_vm1, %v1020_v8, 0.0  ;;  %v1539_v8 = vsub.f32 1.5, %v1538_v50 }
 0x2c9   : > { %v1526_v25 = vmul.f32 %v3036_v34, %v1376_v49  ;;  %vm1532_vm5 = vweird.f32 %v3036_v34  ;;  %v1022_v49 = vmul.f32 %v958_v31, %v958_v31 }
 0x2ca   : > { %3037 = vtanh.f32 %v2505_v3  ;;  %v1984_v3 = vpop.f32.mrf.mxu3  ;;  %vm1533_vm8 = vmor %vm1531_vm7, %vm1532_vm5  ;;  %v1540_v50 = vmul.f32 %v4317_v7, %v1539_v8 }
 0x2cb   : > { %v1527_v28 = vmul.f32 %v3036_v34, %v1526_v25  ;;  %v1868_v25 = vpop.f32.mrf.mxu0 }
 0x2cc   : > { %v1544_v8 = vsel %vm1543_vm11, %v4317_v7, %v1540_v50 }
 0x2cd   : > { %v1528_v6 = vmul.f32 0.5, %v1527_v28 }
 0x2ce   : > { %v1073_v60 = vpop.xlane.xlu2 %1072 }
 0x2cf   : > { %v1281_v4 = vadd.f32 %v4251_v27, %v1073_v60  ;;  %v1529_v63 = vsub.f32 1.5, %v1528_v6  ;;  %v4337_v27 = vpop.f32.mrf.mxu1  ;;  %v3157_v6 = vld [vmem:[%s3269_s11 + $0x8] sm:$0xff] }
 0x2d0   : > { %v3038_v20 = vpop.eup %3037 }
 0x2d1   : > { %v1346_v55 = vmul.f32 0.015625, %v1281_v4  ;;  %v1530_v53 = vmul.f32 %v3036_v34, %v1529_v63  ;;  %v2630_v0 = vmul.f32 0.001, %v3038_v20  ;;  %v4340_v4 = vpop.xlane.xlu1 %1096  ;;  %v4795_v20 = vsub.f32 %v3891_v36, %v3889_v61  ;;  %v4360_v36 = vld [vmem:[%s4728_s5] ss:$0 sm:$0xff] }
 0x2d2   : > { %1105 = vadd.xlane.f32.xlu2 %v1104_v45  ;;  %v2065_v29 = vmul.f32 %v4360_v36, %v3836_v33 }
 0x2d3   : > { %v4335_v32 = vadd.f32 1e-06, %v1346_v55  ;;  %v1534_v28 = vsel %vm1533_vm8, %v3036_v34, %v1530_v53  ;;  %v2662_v60 = vadd.f32 %v3157_v6, %v2630_v0  ;;  %v1110_v6 = vsel %vm395_vm1, %v1022_v49, 0.0  ;;  %v1987_v49 = vpop.f32.mrf.mxu3 }
 0x2d4   : > { %2188 = vperm.xlu1 %2999, %v1534_v28  }
 0x2d5   : > { %3039 = vrsqrt.f32 %v4335_v32  ;;  %2694 = vst.msk [vmem:[%s4305_s26 + $0x8] sm:$0xff] %vm395_vm1, %v2662_v60  ;;  %vm1551_vm13 = vweird.f32 %v4335_v32 }
 0x2d6   : > { %v1079_v63 = vpop.xlane.xlu2 %1078  ;;  %v2159_v45 = vpop.permute.xlu0 %2158 }
 0x2d7   : > { %v1287_v55 = vadd.f32 %v4266_v14, %v1079_v63  ;;  %v2288_v53 = vmul.f32 %v2159_v45, %v4795_v20  ;;  %v2507_v34 = vpop.f32.mrf.mxu2  ;;  %v3158_v14 = vld [vmem:[%s3269_s11 + $0xe8] sm:$0xff]  ;;  %v1871_v45 = vpop.f32.mrf.mxu0  ;;  %v2097_v20 = vsub.f32 %v1982_v19, %v2065_v29 }
 0x2d8   : > { %v2508_v0 = vadd.f32 %v4292_v51, %v2507_v34  ;;  %v959_v60 = vsub.f32 %v3158_v14, %v4238_v12 }
 0x2d9   : > { %v1348_v31 = vmul.f32 0.015625, %v1287_v55  ;;  %v2324_v28 = vadd.f32 %v4066_v38, %v2288_v53  ;;  %v1310_v55 = vpop.f32.mrf.mxu1 }
 0x2da   : > { %3041 = vtanh.f32 %v2508_v0  ;;  %1111 = vadd.xlane.f32.xlu2 %v1110_v6  ;;  %v1023_v53 = vmul.f32 %v959_v60, %v959_v60 }
 0x2db   : > { %v3040_v61 = vpop.eup %3039  ;;  %v4364_v37 = vadd.f32 1e-06, %v1348_v31  ;;  %v2356_v15 = vmax.f32 %v2324_v28, 0.0  ;;  %v1103_v31 = vpop.xlane.xlu1 %1102  ;;  %v1985_v28 = vadd.f32 %v1984_v3, %v1868_v25 }
 0x2dc   : > { %v1546_v63 = vmul.f32 %v3040_v61, %v4335_v32  ;;  %2193 = vperm.xlu1 %2999, %v1544_v8   ;;  %v1311_v14 = vadd.f32 %v1310_v55, %v1103_v31  ;;  %v1113_v9 = vsel %vm395_vm1, %v1023_v53, 0.0  ;;  %vm1552_vm12 = vweird.f32 %v3040_v61 }
 0x2dd   : > { %3043 = vrsqrt.f32 %v4364_v37  ;;  %2943 = vmatmul.msk.f32.gmra.mxu2 %vm2387_vm6, %v2356_v15  ;;  %v3160_v15 = vld [vmem:[%s3269_s11 + $0xf0] sm:$0xff]  ;;  %vm1553_vm14 = vmor %vm1551_vm13, %vm1552_vm12  ;;  %vm1571_vm0 = vweird.f32 %v4364_v37 }
 0x2de   : > { %v1547_v34 = vmul.f32 %v3040_v61, %v1546_v63  ;;  %v4370_v33 = vpop.xlane.xlu2 %1081  ;;  %v2164_v0 = vpop.permute.xlu0 %2163  ;;  %v960_v19 = vsub.f32 %v3160_v15, %v4255_v30  ;;  %v2066_v63 = vmul.f32 %v4360_v36, %v3865_v59 }
 0x2df   : > { %v2289_v7 = vmul.f32 %v2164_v0, %v2097_v20  ;;  %v3161_v20 = vld [vmem:[%s3269_s11 + $0x10] sm:$0xff] }
 0x2e0   : > { %v3042_v50 = vpop.eup %3041  ;;  %v1548_v6 = vmul.f32 0.5, %v1547_v34  ;;  %v1356_v34 = vmul.f32 0.015625, %v1311_v14  ;;  %v1024_v53 = vmul.f32 %v960_v19, %v960_v19  ;;  %v1874_v14 = vpop.f32.mrf.mxu0 }
 0x2e1   : > { %v2631_v8 = vmul.f32 0.001, %v3042_v50  ;;  %v2325_v12 = vadd.f32 %v4066_v38, %v2289_v7 }
 0x2e2   : > { %1114 = vadd.xlane.f32.xlu2 %v1113_v9  ;;  %v1549_v60 = vsub.f32 1.5, %v1548_v6  ;;  %v2098_v9 = vsub.f32 %v1985_v28, %v2066_v63  ;;  %v4386_v32 = vadd.f32 1e-06, %v1356_v34  ;;  %v1116_v19 = vsel %vm395_vm1, %v1024_v53, 0.0  ;;  %v3162_v63 = vld [vmem:[%s3269_s11 + $0xf8] sm:$0xff] }
 0x2e3   : > { %v3044_v29 = vpop.eup %3043  ;;  %v2663_v3 = vadd.f32 %v3161_v20, %v2631_v8  ;;  %v2357_v25 = vmax.f32 %v2325_v12, 0.0  ;;  %v1990_v8 = vpop.f32.mrf.mxu3  ;;  %v1988_v20 = vadd.f32 %v1987_v49, %v1871_v45 }
 0x2e4   : > { %v1566_v55 = vmul.f32 %v3044_v29, %v4364_v37  ;;  %v1550_v0 = vmul.f32 %v3040_v61, %v1549_v60  ;;  %vm1572_vm15 = vweird.f32 %v3044_v29  ;;  %vm1651_vm4 = vweird.f32 %v4386_v32 }
 0x2e5   : > { %2695 = vst.msk [vmem:[%s4305_s26 + $0x10] sm:$0xff] %vm395_vm1, %v2663_v3  ;;  %2944 = vmatmul.msk.f32.gmra.mxu2 %vm2387_vm6, %v2357_v25  ;;  %v961_v3 = vsub.f32 %v3162_v63, %v4261_v24  ;;  %v2067_v25 = vmul.f32 %v4360_v36, %v3883_v26  ;;  %vm1573_vm2 = vmor %vm1571_vm0, %vm1572_vm15 }
 0x2e6   : > { %v1567_v31 = vmul.f32 %v3044_v29, %v1566_v55  ;;  %v4384_v7 = vpop.xlane.xlu2 %1084  ;;  %v2169_v59 = vpop.permute.xlu0 %2168  ;;  %v1554_v50 = vsel %vm1553_vm14, %v3040_v61, %v1550_v0 }
 0x2e7   : > { %v2290_v12 = vmul.f32 %v2169_v59, %v2098_v9  ;;  %2198 = vperm.xlu0 %2998, %v1554_v50   ;;  %v2510_v6 = vpop.f32.mrf.mxu2  ;;  %v2099_v49 = vsub.f32 %v1988_v20, %v2067_v25  ;;  %v1025_v45 = vmul.f32 %v961_v3, %v961_v3  ;;  %v1991_v59 = vadd.f32 %v1990_v8, %v1874_v14  ;;  %v4796_v20 = vld [vmem:[#allocation19_spill] sm:$0xff]  ;;  %v4797_v25 = vld [vmem:[#allocation20_spill] sm:$0xff] }
 0x2e8   : > { %v1568_v15 = vmul.f32 0.5, %v1567_v31  ;;  %v2511_v60 = vadd.f32 %v4292_v51, %v2510_v6 }
 0x2e9   : > { %v2326_v28 = vadd.f32 %v4066_v38, %v2290_v12  ;;  %v1119_v37 = vsel %vm395_vm1, %v1025_v45, 0.0 }
 0x2ea   : > { %3045 = vtanh.f32 %v2511_v60  ;;  %1117 = vadd.xlane.f32.xlu2 %v1116_v19  ;;  %v1569_v61 = vsub.f32 1.5, %v1568_v15  ;;  %v1877_v15 = vpop.f32.mrf.mxu0  ;;  %v3163_v19 = vld [vmem:[%s3269_s11 + $0x18] sm:$0xff] }
 0x2eb   : > { %v2358_v55 = vmax.f32 %v2326_v28, 0.0  ;;  %3047 = vrsqrt.f32 %v4386_v32  ;;  %v1993_v60 = vpop.f32.mrf.mxu3  ;;  %v2068_v28 = vmul.f32 %v4360_v36, %v4796_v20  ;;  %v1293_v20 = vadd.f32 %v4295_v22, %v4384_v7 }
 0x2ec   : > { %v1570_v34 = vmul.f32 %v3044_v29, %v1569_v61  ;;  %v1994_v3 = vadd.f32 %v1993_v60, %v1877_v15  ;;  %v1296_v22 = vadd.f32 %v4299_v43, %v4329_v35 }
 0x2ed   : > { %2945 = vmatmul.msk.f32.gmra.mxu2 %vm2387_vm6, %v2358_v55  ;;  %v2100_v14 = vsub.f32 %v1991_v59, %v2068_v28  ;;  %v2069_v55 = vmul.f32 %v4360_v36, %v4797_v25  ;;  %v3165_v25 = vld [vmem:[%s3269_s11 + $0xd8] sm:$0xff] }
 0x2ee   : > { %v4398_v0 = vpop.xlane.xlu2 %1093  ;;  %v2174_v9 = vpop.permute.xlu0 %2173  ;;  %v1574_v53 = vsel %vm1573_vm2, %v3044_v29, %v1570_v34 }
 0x2ef   : > { %v2291_v31 = vmul.f32 %v2174_v9, %v2099_v49  ;;  %2208 = vperm.xlu1 %2999, %v1574_v53   ;;  %v2101_v9 = vsub.f32 %v1994_v3, %v2069_v55 }
 0x2f0   : > { %v3046_v26 = vpop.eup %3045 }
 0x2f1   : > { %v2632_v50 = vmul.f32 0.001, %v3046_v26  ;;  %v2327_v12 = vadd.f32 %v4066_v38, %v2291_v31  ;;  %v3048_v6 = vpop.eup %3047  ;;  %v1290_v31 = vadd.f32 %v4281_v41, %v4370_v33  ;;  %v1350_v41 = vmul.f32 0.015625, %v1293_v20 }
 0x2f2   : > { %1120 = vadd.xlane.f32.xlu2 %v1119_v37  ;;  %v1646_v61 = vmul.f32 %v3048_v6, %v4386_v32  ;;  %vm1652_vm3 = vweird.f32 %v3048_v6  ;;  %v1305_v33 = vadd.f32 %v4326_v23, %v4340_v4 }
 0x2f3   : > { %v2664_v63 = vadd.f32 %v3163_v19, %v2632_v50  ;;  %v2359_v29 = vmax.f32 %v2327_v12, 0.0  ;;  %v1349_v59 = vmul.f32 0.015625, %v1290_v31  ;;  %vm1653_vm5 = vmor %vm1651_vm4, %vm1652_vm3  ;;  %v4426_v7 = vadd.f32 1e-06, %v1350_v41 }
 0x2f4   : > { %v1647_v45 = vmul.f32 %v3048_v6, %v1646_v61  ;;  %v1354_v3 = vmul.f32 0.015625, %v1305_v33 }
 0x2f5   : > { %2696 = vst.msk [vmem:[%s4305_s26 + $0x18] sm:$0xff] %vm395_vm1, %v2664_v63  ;;  %2946 = vmatmul.msk.f32.gmra.mxu2 %vm2387_vm6, %v2359_v29  ;;  %v1381_v60 = vadd.f32 1e-06, %v1349_v59  ;;  %vm1591_vm11 = vweird.f32 %v4426_v7 }
 0x2f6   : > { %v2179_v8 = vpop.permute.xlu0 %2178  ;;  %v2184_v49 = vpop.permute.xlu2 %2183  ;;  %v1648_v12 = vmul.f32 0.5, %v1647_v45  ;;  %v4429_v32 = vadd.f32 1e-06, %v1354_v3 }
 0x2f7   : > { %v2292_v34 = vmul.f32 %v2179_v8, %v2100_v14  ;;  %v2293_v26 = vmul.f32 %v2184_v49, %v2101_v9  ;;  %3049 = vrsqrt.f32 %v1381_v60  ;;  %v1351_v8 = vmul.f32 0.015625, %v1296_v22 }
 0x2f8   : > { %v1649_v15 = vsub.f32 1.5, %v1648_v12  ;;  %3051 = vrsqrt.f32 %v4426_v7  ;;  %v1352_v49 = vmul.f32 0.015625, %v4319_v56  ;;  %v1302_v12 = vadd.f32 %v4315_v48, %v4398_v0 }
 0x2f9   : > { %v2328_v53 = vadd.f32 %v4066_v38, %v2292_v34  ;;  %v2329_v37 = vadd.f32 %v4066_v38, %v2293_v26  ;;  %v3164_v38 = vld [vmem:[%s3269_s11 + $0xc0] sm:$0xff]  ;;  %v4434_v55 = vadd.f32 1e-06, %v1351_v8  ;;  %3053 = vrsqrt.f32 %v4429_v32 }
 0x2fa   : > { %v1650_v19 = vmul.f32 %v3048_v6, %v1649_v15  ;;  %v954_v63 = vsub.f32 %v3164_v38, %v4050_v42  ;;  %vm1581_vm8 = vweird.f32 %v1381_v60  ;;  %vm1631_vm14 = vweird.f32 %v4429_v32 }
 0x2fb   : > { %v2360_v50 = vmax.f32 %v2328_v53, 0.0  ;;  %v2361_v28 = vmax.f32 %v2329_v37, 0.0  ;;  %3055 = vrsqrt.f32 %v4434_v55  ;;  %vm1601_vm2 = vweird.f32 %v4434_v55 }
 0x2fc   : > { %v1654_v29 = vsel %vm1653_vm5, %v3048_v6, %v1650_v19  ;;  %v1018_v61 = vmul.f32 %v954_v63, %v954_v63  ;;  %v957_v6 = vsub.f32 %v3165_v25, %v4160_v5  ;;  %v3166_v25 = vld [vmem:[%s3269_s11 + $0x20] sm:$0xff] }
 0x2fd   : > { %2947 = vmatmul.msk.f32.gmra.mxu2 %vm2387_vm6, %v2360_v50  ;;  %v3050_v14 = vpop.eup %3049  ;;  %v4443_v50 = vadd.f32 1e-06, %v1352_v49 }
 0x2fe   : > { %v1576_v23 = vmul.f32 %v3050_v14, %v1381_v60  ;;  %v1098_v4 = vsel %vm395_vm1, %v1018_v61, 0.0  ;;  %v1021_v35 = vmul.f32 %v957_v6, %v957_v6  ;;  %v3052_v34 = vpop.eup %3051  ;;  %vm1582_vm7 = vweird.f32 %v3050_v14 }
 0x2ff   : > { %v1586_v9 = vmul.f32 %v3052_v34, %v4426_v7  ;;  %v4441_v31 = vpop.eup %3053  ;;  %vm1583_vm9 = vmor %vm1581_vm8, %vm1582_vm7  ;;  %vm1592_vm10 = vweird.f32 %v3052_v34  ;;  %vm1611_vm5 = vweird.f32 %v4443_v50 }
 0x300   : > { %v1577_v43 = vmul.f32 %v3050_v14, %v1576_v23  ;;  %v1107_v53 = vsel %vm395_vm1, %v1021_v35, 0.0  ;;  %v1626_v56 = vmul.f32 %v4441_v31, %v4429_v32  ;;  %vm1593_vm12 = vmor %vm1591_vm11, %vm1592_vm10  ;;  %vm1632_vm13 = vweird.f32 %v4441_v31 }
 0x301   : > { %v1587_v37 = vmul.f32 %v3052_v34, %v1586_v9  ;;  %v4448_v20 = vpop.eup %3055  ;;  %vm1633_vm15 = vmor %vm1631_vm14, %vm1632_vm13 }
 0x302   : > { %v1578_v45 = vmul.f32 0.5, %v1577_v43  ;;  %v1596_v19 = vmul.f32 %v4448_v20, %v4434_v55  ;;  %v1627_v48 = vmul.f32 %v4441_v31, %v1626_v56  ;;  %v3167_v56 = vld [vmem:[%s3269_s11 + $0x28] sm:$0xff]  ;;  %vm1602_vm0 = vweird.f32 %v4448_v20 }
 0x303   : > { %v1588_v41 = vmul.f32 0.5, %v1587_v37  ;;  %vm1603_vm3 = vmor %vm1601_vm2, %vm1602_vm0 }
 0x304   : > { %v1579_v15 = vsub.f32 1.5, %v1578_v45  ;;  %v1597_v22 = vmul.f32 %v4448_v20, %v1596_v19 }
 0x305   : > { %2948 = vmatmul.msk.f32.gmra.mxu2 %vm2387_vm6, %v2361_v28  ;;  %v1353_v28 = vmul.f32 0.015625, %v1302_v12  ;;  %v1589_v8 = vsub.f32 1.5, %v1588_v41 }
 0x306   : > { %v1580_v33 = vmul.f32 %v3050_v14, %v1579_v15  ;;  %v1598_v60 = vmul.f32 0.5, %v1597_v22  ;;  %v3168_v22 = vld [vmem:[%s3269_s11 + $0x30] sm:$0xff] }
 0x307   : > { %v4456_v63 = vadd.f32 1e-06, %v1353_v28  ;;  %v1590_v35 = vmul.f32 %v3052_v34, %v1589_v8 }
 0x308   : > { %v1584_v61 = vsel %vm1583_vm9, %v3050_v14, %v1580_v33 }
 0x309   : > { %v1594_v12 = vsel %vm1593_vm12, %v3052_v34, %v1590_v35  ;;  %vm1621_vm9 = vweird.f32 %v4456_v63 }
 0x30a   : > { %2248 = vperm.xlu2 %2997, %v1654_v29  }
 0x311   : > { %1099 = vadd.xlane.f32.xlu0 %v1098_v4  ;;  %v1628_v4 = vmul.f32 0.5, %v1627_v48 }
 0x313   : > { %v1629_v49 = vsub.f32 1.5, %v1628_v4  ;;  %v1880_v4 = vpop.f32.mrf.mxu0 }
 0x315   : > { %v1630_v15 = vmul.f32 %v4441_v31, %v1629_v49  ;;  %v2070_v49 = vmul.f32 %v4360_v36, %v3921_v2  ;;  %v4798_v2 = vld [vmem:[#allocation6_spill] sm:$0xff] }
 0x317   : > { %v1634_v41 = vsel %vm1633_vm15, %v4441_v31, %v1630_v15 }
 0x319   : > { %1108 = vadd.xlane.f32.xlu1 %v1107_v53 }
 0x31a   : > { %v2513_v26 = vpop.f32.mrf.mxu2 }
 0x31b   : > { %v2514_v59 = vadd.f32 %v4292_v51, %v2513_v26 }
 0x31d   : > { %3057 = vtanh.f32 %v2514_v59  ;;  %v1599_v59 = vsub.f32 1.5, %v1598_v60 }
 0x31e   : > { %3059 = vrsqrt.f32 %v4443_v50 }
 0x31f   : > { %v1600_v34 = vmul.f32 %v4448_v20, %v1599_v59  ;;  %v4495_v59 = vld [vmem:[%s4727_s4] ss:$0 sm:$0xff] }
 0x322   : > { %v2516_v0 = vpop.f32.mrf.mxu2 }
 0x323   : > { %v3058_v38 = vpop.eup %3057  ;;  %v2517_v29 = vadd.f32 %v4292_v51, %v2516_v0  ;;  %v1604_v0 = vsel %vm1603_vm3, %v4448_v20, %v1600_v34 }
 0x324   : > { %v2633_v3 = vmul.f32 0.001, %v3058_v38  ;;  %v3060_v23 = vpop.eup %3059 }
 0x325   : > { %3061 = vtanh.f32 %v2517_v29  ;;  %2213 = vperm.xlu0 %2998, %v1584_v61   ;;  %v1606_v43 = vmul.f32 %v3060_v23, %v4443_v50  ;;  %v4479_v29 = vpop.f32.mrf.mxu1  ;;  %v1996_v61 = vpop.f32.mrf.mxu3  ;;  %vm1612_vm4 = vweird.f32 %v3060_v23 }
 0x326   : > { %v2665_v6 = vadd.f32 %v3166_v25, %v2633_v3  ;;  %3063 = vrsqrt.f32 %v4456_v63  ;;  %vm1613_vm7 = vmor %vm1611_vm5, %vm1612_vm4 }
 0x327   : > { %v1607_v53 = vmul.f32 %v3060_v23, %v1606_v43  ;;  %v1997_v43 = vadd.f32 %v1996_v61, %v1880_v4 }
 0x328   : > { %2697 = vst.msk [vmem:[%s4305_s26 + $0x20] sm:$0xff] %vm395_vm1, %v2665_v6  ;;  %v2204_v6 = vpop.permute.xlu2 %2203 }
 0x329   : > { %v1608_v7 = vmul.f32 0.5, %v1607_v53 }
 0x32a   : > { %v2519_v45 = vpop.f32.mrf.mxu2 }
 0x32b   : > { %v3062_v14 = vpop.eup %3061  ;;  %v2520_v9 = vadd.f32 %v4292_v51, %v2519_v45  ;;  %v1609_v38 = vsub.f32 1.5, %v1608_v7  ;;  %v1883_v45 = vpop.f32.mrf.mxu0 }
 0x32c   : > { %v2634_v26 = vmul.f32 0.001, %v3062_v14  ;;  %v3064_v37 = vpop.eup %3063 }
 0x32d   : > { %3065 = vtanh.f32 %v2520_v9  ;;  %2218 = vperm.xlu0 %2998, %v1594_v12   ;;  %v1616_v19 = vmul.f32 %v3064_v37, %v4456_v63  ;;  %v1610_v31 = vmul.f32 %v3060_v23, %v1609_v38  ;;  %v4485_v20 = vpop.f32.mrf.mxu1  ;;  %vm1622_vm8 = vweird.f32 %v3064_v37  ;;  %v1999_v35 = vpop.f32.mrf.mxu3 }
 0x32e   : > { %v2666_v28 = vadd.f32 %v3167_v56, %v2634_v26  ;;  %vm1623_vm10 = vmor %vm1621_vm9, %vm1622_vm8  ;;  %v2000_v26 = vadd.f32 %v1999_v35, %v1883_v45  ;;  %v2071_v56 = vmul.f32 %v4360_v36, %v4798_v2 }
 0x32f   : > { %v1617_v32 = vmul.f32 %v3064_v37, %v1616_v19  ;;  %v1614_v55 = vsel %vm1613_vm7, %v3060_v23, %v1610_v31  ;;  %v2102_v23 = vsub.f32 %v1997_v43, %v2070_v49 }
 0x330   : > { %2698 = vst.msk [vmem:[%s4305_s26 + $0x28] sm:$0xff] %vm395_vm1, %v2666_v28  ;;  %v2103_v19 = vsub.f32 %v2000_v26, %v2071_v56 }
 0x331   : > { %v1618_v8 = vmul.f32 0.5, %v1617_v32 }
 0x332   : > { %2238 = vperm.xlu1 %2999, %v1634_v41  }
 0x333   : > { %v3066_v33 = vpop.eup %3065  ;;  %v1619_v25 = vsub.f32 1.5, %v1618_v8  ;;  %v2072_v8 = vmul.f32 %v4360_v36, %v3978_v21 }
 0x334   : > { %v2635_v48 = vmul.f32 0.001, %v3066_v33 }
 0x335   : > { %2223 = vperm.xlu0 %2998, %v1604_v0   ;;  %v1620_v60 = vmul.f32 %v3064_v37, %v1619_v25  ;;  %v1319_v12 = vpop.f32.mrf.mxu1  ;;  %v2002_v15 = vpop.f32.mrf.mxu3 }
 0x336   : > { %v2667_v3 = vadd.f32 %v3168_v22, %v2635_v48 }
 0x337   : > { %v1624_v14 = vsel %vm1623_vm10, %v3064_v37, %v1620_v60  ;;  %v1886_v37 = vpop.f32.mrf.mxu0  ;;  %v2073_v60 = vmul.f32 %v4360_v36, %v3982_v58  ;;  %v2074_v58 = vmul.f32 %v4360_v36, %v4002_v11 }
 0x338   : > { %2699 = vst.msk [vmem:[%s4305_s26 + $0x30] sm:$0xff] %vm395_vm1, %v2667_v3  ;;  %v2003_v3 = vadd.f32 %v2002_v15, %v1886_v37 }
 0x33a   : > { %v2104_v43 = vsub.f32 %v2003_v3, %v2072_v8 }
 0x33d   : > { %2228 = vperm.xlu0 %2998, %v1614_v55   ;;  %v1322_v38 = vpop.f32.mrf.mxu1  ;;  %v2005_v61 = vpop.f32.mrf.mxu3 }
 0x33f   : > { %v1889_v31 = vpop.f32.mrf.mxu0 }
 0x340   : > { %v2006_v25 = vadd.f32 %v2005_v61, %v1889_v31 }
 0x345   : > { %v4490_v50 = vpop.xlane.xlu2 %1105  ;;  %2233 = vperm.xlu0 %2998, %v1624_v14   ;;  %v1325_v14 = vpop.f32.mrf.mxu1 }
 0x346   : > { %v2189_v9 = vpop.permute.xlu1 %2188  ;;  %v2008_v56 = vpop.f32.mrf.mxu3 }
 0x347   : > { %v2294_v53 = vmul.f32 %v2189_v9, %v2102_v23  ;;  %v2105_v9 = vsub.f32 %v2006_v25, %v2073_v60  ;;  %v1892_v2 = vpop.f32.mrf.mxu0 }
 0x349   : > { %v2330_v63 = vadd.f32 %v4495_v59, %v2294_v53 }
 0x34b   : > { %v2362_v28 = vmax.f32 %v2330_v63, 0.0 }
 0x34d   : > { %v1112_v7 = vpop.xlane.xlu2 %1111  ;;  %2949 = vmatmul.msk.f32.gmra.mxu2 %vm2387_vm6, %v2362_v28  ;;  %v2009_v28 = vadd.f32 %v2008_v56, %v1892_v2 }
 0x34e   : > { %v1320_v34 = vadd.f32 %v1319_v12, %v1112_v7  ;;  %v2194_v41 = vpop.permute.xlu1 %2193  ;;  %v2297_v12 = vmul.f32 %v2204_v6, %v2105_v9 }
 0x34f   : > { %v2295_v33 = vmul.f32 %v2194_v41, %v2103_v19 }
 0x350   : > { %v1359_v32 = vmul.f32 0.015625, %v1320_v34 }
 0x351   : > { %v2331_v48 = vadd.f32 %v4495_v59, %v2295_v33  ;;  %v2333_v33 = vadd.f32 %v4495_v59, %v2297_v12 }
 0x352   : > { %v1391_v0 = vadd.f32 1e-06, %v1359_v32 }
 0x353   : > { %v2363_v22 = vmax.f32 %v2331_v48, 0.0  ;;  %v2365_v61 = vmax.f32 %v2333_v33, 0.0 }
 0x354   : > { %3067 = vrsqrt.f32 %v1391_v0  ;;  %vm1681_vm12 = vweird.f32 %v1391_v0 }
 0x355   : > { %v1115_v4 = vpop.xlane.xlu2 %1114  ;;  %2950 = vmatmul.msk.f32.gmra.mxu2 %vm2387_vm6, %v2363_v22  ;;  %v1328_v22 = vpop.f32.mrf.mxu1 }
 0x356   : > { %v4505_v55 = vadd.f32 %v1322_v38, %v1115_v4  ;;  %v2106_v38 = vsub.f32 %v2009_v28, %v2074_v58 }
 0x359   : > { %v2199_v35 = vpop.permute.xlu0 %2198 }
 0x35a   : > { %v3068_v49 = vpop.eup %3067  ;;  %v2296_v45 = vmul.f32 %v2199_v35, %v2104_v43 }
 0x35b   : > { %v1676_v23 = vmul.f32 %v3068_v49, %v1391_v0  ;;  %vm1682_vm11 = vweird.f32 %v3068_v49 }
 0x35c   : > { %v2332_v21 = vadd.f32 %v4495_v59, %v2296_v45  ;;  %vm1683_vm13 = vmor %vm1681_vm12, %vm1682_vm11 }
 0x35d   : > { %v1677_v53 = vmul.f32 %v3068_v49, %v1676_v23  ;;  %v1118_v26 = vpop.xlane.xlu2 %1117 }
 0x35e   : > { %v2364_v63 = vmax.f32 %v2332_v21, 0.0  ;;  %v1326_v15 = vadd.f32 %v1325_v14, %v1118_v26 }
 0x35f   : > { %v1678_v37 = vmul.f32 0.5, %v1677_v53 }
 0x360   : > { %v1361_v7 = vmul.f32 0.015625, %v1326_v15  ;;  %v2522_v19 = vpop.f32.mrf.mxu2  ;;  %2951 = vmatmul.msk.f32.gmra.mxu2 %vm2387_vm6, %v2364_v63 }
 0x361   : > { %v2523_v34 = vadd.f32 %v4292_v51, %v2522_v19  ;;  %v1679_v41 = vsub.f32 1.5, %v1678_v37  ;;  %v2209_v32 = vpop.permute.xlu1 %2208 }
 0x362   : > { %v1393_v6 = vadd.f32 1e-06, %v1361_v7  ;;  %v2298_v8 = vmul.f32 %v2209_v32, %v2106_v38  ;;  %v3171_v7 = vld [vmem:[%s3269_s11 + $0x40] sm:$0xff] }
 0x363   : > { %3069 = vtanh.f32 %v2523_v34  ;;  %v1680_v48 = vmul.f32 %v3068_v49, %v1679_v41 }
 0x364   : > { %3071 = vrsqrt.f32 %v1393_v6  ;;  %v2334_v45 = vadd.f32 %v4495_v59, %v2298_v8  ;;  %vm1701_vm15 = vweird.f32 %v1393_v6 }
 0x365   : > { %v1121_v11 = vpop.xlane.xlu2 %1120  ;;  %v1684_v3 = vsel %vm1683_vm13, %v3068_v49, %v1680_v48  ;;  %v3170_v49 = vld [vmem:[%s3269_s11 + $0x38] sm:$0xff] }
 0x366   : > { %v1329_v31 = vadd.f32 %v1328_v22, %v1121_v11  ;;  %2263 = vperm.xlu1 %2999, %v1684_v3   ;;  %v2366_v53 = vmax.f32 %v2334_v45, 0.0 }
 0x368   : > { %v1362_v4 = vmul.f32 0.015625, %v1329_v31  ;;  %v2525_v25 = vpop.f32.mrf.mxu2  ;;  %2952 = vmatmul.msk.f32.gmra.mxu2 %vm2387_vm6, %v2365_v61  ;;  %v3172_v61 = vld [vmem:[%s3269_s11 + $0x48] sm:$0xff] }
 0x369   : > { %v3070_v60 = vpop.eup %3069  ;;  %v2526_v43 = vadd.f32 %v4292_v51, %v2525_v25 }
 0x36a   : > { %v3072_v0 = vpop.eup %3071  ;;  %v2636_v35 = vmul.f32 0.001, %v3070_v60  ;;  %v1394_v14 = vadd.f32 1e-06, %v1362_v4 }
 0x36b   : > { %v1696_v23 = vmul.f32 %v3072_v0, %v1393_v6  ;;  %3073 = vtanh.f32 %v2526_v43  ;;  %vm1702_vm14 = vweird.f32 %v3072_v0  ;;  %v1314_v6 = vadd.f32 %v4479_v29, %v4490_v50  ;;  %v3173_v50 = vld [vmem:[%s3269_s11 + $0x50] sm:$0xff] }
 0x36c   : > { %v2668_v9 = vadd.f32 %v3170_v49, %v2636_v35  ;;  %3075 = vrsqrt.f32 %v1394_v14  ;;  %vm1703_vm0 = vmor %vm1701_vm15, %vm1702_vm14  ;;  %vm1711_vm3 = vweird.f32 %v1394_v14  ;;  %v2011_v35 = vpop.f32.mrf.mxu3 }
 0x36d   : > { %v1697_v21 = vmul.f32 %v3072_v0, %v1696_v23  ;;  %v1357_v4 = vmul.f32 0.015625, %v1314_v6  ;;  %v3175_v6 = vld [vmem:[%s3269_s11 + $0x60] sm:$0xff] }
 0x36e   : > { %2700 = vst.msk [vmem:[%s4305_s26 + $0x38] sm:$0xff] %vm395_vm1, %v2668_v9 }
 0x36f   : > { %v1698_v26 = vmul.f32 0.5, %v1697_v21  ;;  %v4533_v29 = vadd.f32 1e-06, %v1357_v4 }
 0x370   : > { %v2528_v12 = vpop.f32.mrf.mxu2  ;;  %2953 = vmatmul.msk.f32.gmra.mxu2 %vm2387_vm6, %v2366_v53 }
 0x371   : > { %v3074_v63 = vpop.eup %3073  ;;  %v2529_v15 = vadd.f32 %v4292_v51, %v2528_v12  ;;  %v1699_v2 = vsub.f32 1.5, %v1698_v26  ;;  %v1895_v12 = vpop.f32.mrf.mxu0  ;;  %vm1661_vm10 = vweird.f32 %v4533_v29 }
 0x372   : > { %v3076_v56 = vpop.eup %3075  ;;  %v2637_v37 = vmul.f32 0.001, %v3074_v63 }
 0x373   : > { %v1706_v28 = vmul.f32 %v3076_v56, %v1394_v14  ;;  %3077 = vtanh.f32 %v2529_v15  ;;  %v1700_v58 = vmul.f32 %v3072_v0, %v1699_v2  ;;  %vm1712_vm2 = vweird.f32 %v3076_v56  ;;  %v3174_v15 = vld [vmem:[%s3269_s11 + $0x58] sm:$0xff] }
 0x374   : > { %v2669_v19 = vadd.f32 %v3171_v7, %v2637_v37  ;;  %vm1713_vm4 = vmor %vm1711_vm3, %vm1712_vm2 }
 0x375   : > { %v1707_v34 = vmul.f32 %v3076_v56, %v1706_v28  ;;  %v1704_v41 = vsel %vm1703_vm0, %v3072_v0, %v1700_v58  ;;  %v1360_v58 = vmul.f32 0.015625, %v4505_v55 }
 0x376   : > { %2701 = vst.msk [vmem:[%s4305_s26 + $0x40] sm:$0xff] %vm395_vm1, %v2669_v19  ;;  %2273 = vperm.xlu2 %2997, %v1704_v41  }
 0x377   : > { %v1708_v33 = vmul.f32 0.5, %v1707_v34 }
 0x378   : > { %v2531_v32 = vpop.f32.mrf.mxu2 }
 0x379   : > { %v3078_v48 = vpop.eup %3077  ;;  %v2532_v38 = vadd.f32 %v4292_v51, %v2531_v32  ;;  %v1709_v22 = vsub.f32 1.5, %v1708_v33  ;;  %v2012_v33 = vadd.f32 %v2011_v35, %v1895_v12  ;;  %v2075_v32 = vmul.f32 %v4360_v36, %v4012_v47  ;;  %v1898_v55 = vpop.f32.mrf.mxu0 }
 0x37a   : > { %v2638_v11 = vmul.f32 0.001, %v3078_v48  ;;  %v2076_v35 = vmul.f32 %v4360_v36, %v4010_v18 }
 0x37b   : > { %3079 = vtanh.f32 %v2532_v38  ;;  %v1710_v3 = vmul.f32 %v3076_v56, %v1709_v22 }
 0x37c   : > { %v2670_v8 = vadd.f32 %v3172_v61, %v2638_v11 }
 0x37d   : > { %v1714_v31 = vsel %vm1713_vm4, %v3076_v56, %v1710_v3 }
 0x37e   : > { %2702 = vst.msk [vmem:[%s4305_s26 + $0x48] sm:$0xff] %vm395_vm1, %v2670_v8  ;;  %2278 = vperm.xlu1 %2999, %v1714_v31   ;;  %v2107_v8 = vsub.f32 %v2012_v33, %v2075_v32 }
 0x380   : > { %v2534_v25 = vpop.f32.mrf.mxu2 }
 0x381   : > { %v3080_v60 = vpop.eup %3079  ;;  %v2535_v43 = vadd.f32 %v4292_v51, %v2534_v25  ;;  %v1901_v12 = vpop.f32.mrf.mxu0 }
 0x382   : > { %v2639_v0 = vmul.f32 0.001, %v3080_v60 }
 0x383   : > { %3081 = vtanh.f32 %v2535_v43 }
 0x384   : > { %v2671_v45 = vadd.f32 %v3173_v50, %v2639_v0  ;;  %v1100_v14 = vpop.xlane.xlu0 %1099  ;;  %3083 = vrsqrt.f32 %v4533_v29 }
 0x385   : > { %v1308_v23 = vadd.f32 %v4337_v27, %v1100_v14  ;;  %v2014_v27 = vpop.f32.mrf.mxu3 }
 0x386   : > { %2703 = vst.msk [vmem:[%s4305_s26 + $0x50] sm:$0xff] %vm395_vm1, %v2671_v45  ;;  %v2015_v0 = vadd.f32 %v2014_v27, %v1898_v55 }
 0x387   : > { %v1355_v49 = vmul.f32 0.015625, %v1308_v23 }
 0x388   : > { %v2537_v9 = vpop.f32.mrf.mxu2 }
 0x389   : > { %v3082_v21 = vpop.eup %3081  ;;  %v1387_v53 = vadd.f32 1e-06, %v1355_v49  ;;  %v2538_v26 = vadd.f32 %v4292_v51, %v2537_v9 }
 0x38a   : > { %v2640_v63 = vmul.f32 0.001, %v3082_v21  ;;  %v4542_v37 = vpop.eup %3083 }
 0x38b   : > { %3085 = vrsqrt.f32 %v1387_v53  ;;  %v1656_v51 = vmul.f32 %v4542_v37, %v4533_v29  ;;  %vm1641_vm7 = vweird.f32 %v1387_v53  ;;  %vm1662_vm9 = vweird.f32 %v4542_v37 }
 0x38c   : > { %v2672_v2 = vadd.f32 %v3174_v15, %v2640_v63  ;;  %3087 = vtanh.f32 %v2538_v26  ;;  %v1109_v56 = vpop.xlane.xlu1 %1108  ;;  %v2108_v63 = vsub.f32 %v2015_v0, %v2076_v35  ;;  %vm1663_vm11 = vmor %vm1661_vm10, %vm1662_vm9  ;;  %v2078_v29 = vmul.f32 %v4360_v36, %v4048_v62 }
 0x38d   : > { %v1317_v28 = vadd.f32 %v4485_v20, %v1109_v56  ;;  %v4554_v20 = vadd.f32 1e-06, %v1360_v58  ;;  %v1657_v22 = vmul.f32 %v4542_v37, %v1656_v51  ;;  %v2017_v31 = vpop.f32.mrf.mxu3  ;;  %v2077_v58 = vmul.f32 %v4360_v36, %v4024_v40 }
 0x38e   : > { %2704 = vst.msk [vmem:[%s4305_s26 + $0x58] sm:$0xff] %vm395_vm1, %v2672_v2  ;;  %v2079_v62 = vmul.f32 %v4360_v36, %v4102_v46 }
 0x38f   : > { %v1358_v7 = vmul.f32 0.015625, %v1317_v28  ;;  %v1658_v4 = vmul.f32 0.5, %v1657_v22  ;;  %v2018_v28 = vadd.f32 %v2017_v31, %v1901_v12  ;;  %vm1691_vm0 = vweird.f32 %v4554_v20 }
 0x391   : > { %v3086_v19 = vpop.eup %3085  ;;  %v4550_v34 = vadd.f32 1e-06, %v1358_v7  ;;  %v1659_v21 = vsub.f32 1.5, %v1658_v4  ;;  %v2109_v32 = vsub.f32 %v2018_v28, %v2077_v58 }
 0x392   : > { %v3088_v41 = vpop.eup %3087  ;;  %v1636_v48 = vmul.f32 %v3086_v19, %v1387_v53  ;;  %vm1642_vm5 = vweird.f32 %v3086_v19 }
 0x393   : > { %v2641_v38 = vmul.f32 0.001, %v3088_v41  ;;  %3089 = vrsqrt.f32 %v4550_v34  ;;  %vm1643_vm8 = vmor %vm1641_vm7, %vm1642_vm5  ;;  %v1660_v53 = vmul.f32 %v4542_v37, %v1659_v21  ;;  %vm1671_vm13 = vweird.f32 %v4550_v34 }
 0x394   : > { %v1637_v11 = vmul.f32 %v3086_v19, %v1636_v48  ;;  %3091 = vrsqrt.f32 %v4554_v20  ;;  %v1904_v48 = vpop.f32.mrf.mxu0 }
 0x395   : > { %v2673_v3 = vadd.f32 %v3175_v6, %v2641_v38  ;;  %v2020_v15 = vpop.f32.mrf.mxu3  ;;  %v1664_v41 = vsel %vm1663_vm11, %v4542_v37, %v1660_v53 }
 0x396   : > { %v1638_v61 = vmul.f32 0.5, %v1637_v11  ;;  %v2021_v6 = vadd.f32 %v2020_v15, %v1904_v48 }
 0x397   : > { %2705 = vst.msk [vmem:[%s4305_s26 + $0x60] sm:$0xff] %vm395_vm1, %v2673_v3  ;;  %v2214_v47 = vpop.permute.xlu0 %2213 }
 0x398   : > { %v2299_v25 = vmul.f32 %v2214_v47, %v2107_v8  ;;  %v1639_v60 = vsub.f32 1.5, %v1638_v61  ;;  %v2110_v31 = vsub.f32 %v2021_v6, %v2078_v29  ;;  %v3180_v29 = vld [vmem:[%s3269_s11 + $0x80] sm:$0xff] }
 0x399   : > { %v3090_v43 = vpop.eup %3089 }
 0x39a   : > { %v1666_v50 = vmul.f32 %v3090_v43, %v4550_v34  ;;  %v2335_v45 = vadd.f32 %v4495_v59, %v2299_v25  ;;  %v1640_v14 = vmul.f32 %v3086_v19, %v1639_v60  ;;  %v3092_v26 = vpop.eup %3091  ;;  %vm1672_vm12 = vweird.f32 %v3090_v43 }
 0x39b   : > { %v1686_v18 = vmul.f32 %v3092_v26, %v4554_v20  ;;  %vm1673_vm14 = vmor %vm1671_vm13, %vm1672_vm12  ;;  %vm1692_vm15 = vweird.f32 %v3092_v26 }
 0x39c   : > { %v1667_v23 = vmul.f32 %v3090_v43, %v1666_v50  ;;  %v2367_v49 = vmax.f32 %v2335_v45, 0.0  ;;  %v1644_v9 = vsel %vm1643_vm8, %v3086_v19, %v1640_v14  ;;  %vm1693_vm2 = vmor %vm1691_vm0, %vm1692_vm15  ;;  %v2080_v45 = vmul.f32 %v4360_v36, %v4034_v44  ;;  %v4597_v36 = vld [vmem:[%s4730_s7] ss:$0 sm:$0xff] }
 0x39d   : > { %2243 = vperm.xlu0 %2998, %v1644_v9   ;;  %v1687_v51 = vmul.f32 %v3092_v26, %v1686_v18  ;;  %v2023_v40 = vpop.f32.mrf.mxu3 }
 0x39e   : > { %2954 = vmatmul.msk.f32.gmra.mxu2 %vm2387_vm6, %v2367_v49  ;;  %v1668_v56 = vmul.f32 0.5, %v1667_v23  ;;  %v2024_v60 = vadd.f32 %v2023_v40, %v4120_v39 }
 0x39f   : > { %v2219_v2 = vpop.permute.xlu0 %2218  ;;  %v1688_v55 = vmul.f32 0.5, %v1687_v51 }
 0x3a0   : > { %v2300_v27 = vmul.f32 %v2219_v2, %v2108_v63  ;;  %v1669_v33 = vsub.f32 1.5, %v1668_v56  ;;  %v2111_v39 = vsub.f32 %v2024_v60, %v2079_v62  ;;  %v3177_v56 = vld [vmem:[%s3269_s11 + $0x68] sm:$0xff]  ;;  %v4623_v62 = vld [vmem:[%s4728_s5] ss:$0 sm:$0xff] }
 0x3a1   : > { %v1689_v8 = vsub.f32 1.5, %v1688_v55 }
 0x3a2   : > { %v2336_v7 = vadd.f32 %v4495_v59, %v2300_v27  ;;  %v1670_v11 = vmul.f32 %v3090_v43, %v1669_v33 }
 0x3a3   : > { %v1690_v25 = vmul.f32 %v3092_v26, %v1689_v8 }
 0x3a4   : > { %v2368_v19 = vmax.f32 %v2336_v7, 0.0  ;;  %v1674_v61 = vsel %vm1673_vm14, %v3090_v43, %v1670_v11  ;;  %v2239_v46 = vpop.permute.xlu1 %2238  ;;  %v3178_v7 = vld [vmem:[%s3269_s11 + $0x70] sm:$0xff] }
 0x3a5   : > { %2253 = vperm.xlu0 %2998, %v1664_v41   ;;  %v2026_v34 = vpop.f32.mrf.mxu3  ;;  %v1694_v35 = vsel %vm1693_vm2, %v3092_v26, %v1690_v25 }
 0x3a6   : > { %2955 = vmatmul.msk.f32.gmra.mxu2 %vm2387_vm6, %v2368_v19  ;;  %v2027_v50 = vadd.f32 %v2026_v34, %v4143_v16 }
 0x3a7   : > { %v2224_v38 = vpop.permute.xlu0 %2223 }
 0x3a8   : > { %v2301_v22 = vmul.f32 %v2224_v38, %v2109_v32  ;;  %v2112_v49 = vsub.f32 %v2027_v50, %v2080_v45  ;;  %v3179_v38 = vld [vmem:[%s3269_s11 + $0x78] sm:$0xff] }
 0x3aa   : > { %v2337_v3 = vadd.f32 %v4495_v59, %v2301_v22  ;;  %v2304_v20 = vmul.f32 %v2239_v46, %v2112_v49 }
 0x3ac   : > { %v2369_v37 = vmax.f32 %v2337_v3, 0.0  ;;  %v2340_v16 = vadd.f32 %v4495_v59, %v2304_v20 }
 0x3ad   : > { %2258 = vperm.xlu0 %2998, %v1674_v61  }
 0x3ae   : > { %2956 = vmatmul.msk.f32.gmra.mxu2 %vm2387_vm6, %v2369_v37  ;;  %v2372_v26 = vmax.f32 %v2340_v16, 0.0  ;;  %v2029_v37 = vpop.f32.mrf.mxu3 }
 0x3af   : > { %v2229_v47 = vpop.permute.xlu0 %2228  ;;  %v2030_v60 = vadd.f32 %v2029_v37, %v4167_v13 }
 0x3b0   : > { %v2302_v4 = vmul.f32 %v2229_v47, %v2110_v31  ;;  %v3181_v31 = vld [vmem:[%s3269_s11 + $0x88] sm:$0xff] }
 0x3b2   : > { %v2338_v0 = vadd.f32 %v4495_v59, %v2302_v4 }
 0x3b4   : > { %v2370_v43 = vmax.f32 %v2338_v0, 0.0  ;;  %v2081_v0 = vmul.f32 %v4623_v62, %v4050_v42  ;;  %v2083_v42 = vmul.f32 %v4623_v62, %v4122_v1 }
 0x3b5   : > { %2268 = vperm.xlu0 %2998, %v1694_v35  }
 0x3b6   : > { %2957 = vmatmul.msk.f32.gmra.mxu2 %vm2387_vm6, %v2370_v43  ;;  %v2032_v4 = vpop.f32.mrf.mxu3  ;;  %v2082_v43 = vmul.f32 %v4623_v62, %v4093_v54  ;;  %v2113_v35 = vsub.f32 %v2030_v60, %v2081_v0  ;;  %v3184_v60 = vld [vmem:[%s3269_s11 + $0x98] sm:$0xff] }
 0x3b7   : > { %v2234_v14 = vpop.permute.xlu0 %2233  ;;  %v2033_v34 = vadd.f32 %v2032_v4, %v4189_v10 }
 0x3b8   : > { %v2303_v23 = vmul.f32 %v2234_v14, %v2111_v39  ;;  %v2249_v39 = vpop.permute.xlu2 %2248 }
 0x3ba   : > { %v2339_v9 = vadd.f32 %v4495_v59, %v2303_v23  ;;  %v2114_v23 = vsub.f32 %v2033_v34, %v2082_v43  ;;  %v4802_v34 = vld [vmem:[#allocation3_spill] sm:$0xff] }
 0x3bc   : > { %v2371_v21 = vmax.f32 %v2339_v9, 0.0  ;;  %v2306_v46 = vmul.f32 %v2249_v39, %v2114_v23 }
 0x3be   : > { %2958 = vmatmul.msk.f32.gmra.mxu2 %vm2387_vm6, %v2371_v21  ;;  %v2035_v25 = vpop.f32.mrf.mxu3  ;;  %v2342_v54 = vadd.f32 %v4495_v59, %v2306_v46 }
 0x3bf   : > { %v2036_v9 = vadd.f32 %v2035_v25, %v4212_v52 }
 0x3c0   : > { %v2374_v16 = vmax.f32 %v2342_v54, 0.0  ;;  %v4803_v54 = vld [vmem:[#allocation4_spill] sm:$0xff] }
 0x3c1   : > { %v2115_v20 = vsub.f32 %v2036_v9, %v2083_v42 }
 0x3c6   : > { %2959 = vmatmul.msk.f32.gmra.mxu2 %vm2387_vm6, %v2372_v26  ;;  %v2038_v14 = vpop.f32.mrf.mxu3 }
 0x3ce   : > { %v2041_v21 = vpop.f32.mrf.mxu3 }
 0x3d0   : > { %v2540_v44 = vpop.f32.mrf.mxu2 }
 0x3d1   : > { %v2541_v12 = vadd.f32 %v4597_v36, %v2540_v44  ;;  %v2039_v44 = vadd.f32 %v2038_v14, %v4235_v57  ;;  %v4799_v57 = vld [vmem:[#allocation15_spill] sm:$0xff] }
 0x3d3   : > { %3093 = vtanh.f32 %v2541_v12  ;;  %v2084_v12 = vmul.f32 %v4623_v62, %v4160_v5 }
 0x3d8   : > { %v2543_v63 = vpop.f32.mrf.mxu2 }
 0x3d9   : > { %v3094_v15 = vpop.eup %3093  ;;  %v2544_v2 = vadd.f32 %v4597_v36, %v2543_v63 }
 0x3da   : > { %v2642_v18 = vmul.f32 0.001, %v3094_v15  ;;  %v2116_v15 = vsub.f32 %v2039_v44, %v2084_v12 }
 0x3db   : > { %3095 = vtanh.f32 %v2544_v2 }
 0x3dc   : > { %v2674_v27 = vadd.f32 %v3177_v56, %v2642_v18 }
 0x3de   : > { %2706 = vst.msk [vmem:[%s4305_s26 + $0x68] sm:$0xff] %vm395_vm1, %v2674_v27  ;;  %v2042_v27 = vadd.f32 %v2041_v21, %v4249_v17  ;;  %v3183_v17 = vld [vmem:[%s3269_s11 + $0x90] sm:$0xff]  ;;  %v2088_v21 = vmul.f32 %v4623_v62, %v4261_v24  ;;  %v3186_v24 = vld [vmem:[%s3269_s11 + $0xa8] sm:$0xff] }
 0x3e1   : > { %v3096_v53 = vpop.eup %3095 }
 0x3e2   : > { %v2643_v28 = vmul.f32 0.001, %v3096_v53  ;;  %v2044_v53 = vpop.f32.mrf.mxu3 }
 0x3e3   : > { %v2546_v58 = vpop.f32.mrf.mxu2 }
 0x3e4   : > { %v2675_v51 = vadd.f32 %v3178_v7, %v2643_v28  ;;  %v2547_v19 = vadd.f32 %v4597_v36, %v2546_v58  ;;  %v2085_v28 = vmul.f32 %v4623_v62, %v4799_v57  ;;  %v2264_v58 = vpop.permute.xlu1 %2263 }
 0x3e6   : > { %2707 = vst.msk [vmem:[%s4305_s26 + $0x70] sm:$0xff] %vm395_vm1, %v2675_v51  ;;  %3097 = vtanh.f32 %v2547_v19  ;;  %v2117_v19 = vsub.f32 %v2042_v27, %v2085_v28 }
 0x3eb   : > { %v2549_v41 = vpop.f32.mrf.mxu2 }
 0x3ec   : > { %v3098_v33 = vpop.eup %3097  ;;  %v2550_v32 = vadd.f32 %v4597_v36, %v2549_v41 }
 0x3ed   : > { %v2644_v48 = vmul.f32 0.001, %v3098_v33 }
 0x3ee   : > { %3099 = vtanh.f32 %v2550_v32  ;;  %v2309_v32 = vmul.f32 %v2264_v58, %v2117_v19  ;;  %v3188_v19 = vld [vmem:[%s3269_s11 + $0xb8] sm:$0xff] }
 0x3ef   : > { %v2676_v55 = vadd.f32 %v3179_v38, %v2644_v48 }
 0x3f1   : > { %2708 = vst.msk [vmem:[%s4305_s26 + $0x78] sm:$0xff] %vm395_vm1, %v2676_v55  ;;  %v4800_v55 = vld [vmem:[#allocation17_spill] sm:$0xff] }
 0x3f3   : > { %v2552_v22 = vpop.f32.mrf.mxu2 }
 0x3f4   : > { %v3100_v11 = vpop.eup %3099  ;;  %v2553_v40 = vadd.f32 %v4597_v36, %v2552_v22  ;;  %v2045_v22 = vadd.f32 %v2044_v53, %v4800_v55  ;;  %v3189_v55 = vld [vmem:[%s3269_s11 + $0xc0] sm:$0xff] }
 0x3f5   : > { %v2645_v6 = vmul.f32 0.001, %v3100_v11  ;;  %v4801_v11 = vld [vmem:[#allocation2_spill] sm:$0xff] }
 0x3f6   : > { %3101 = vtanh.f32 %v2553_v40  ;;  %v2086_v40 = vmul.f32 %v4623_v62, %v4801_v11 }
 0x3f7   : > { %v2677_v3 = vadd.f32 %v3180_v29, %v2645_v6  ;;  %v2047_v6 = vpop.f32.mrf.mxu3  ;;  %v2345_v29 = vadd.f32 %v4495_v59, %v2309_v32 }
 0x3f8   : > { %v2048_v43 = vadd.f32 %v2047_v6, %v4802_v34 }
 0x3f9   : > { %2709 = vst.msk [vmem:[%s4305_s26 + $0x80] sm:$0xff] %vm395_vm1, %v2677_v3  ;;  %v2377_v4 = vmax.f32 %v2345_v29, 0.0 }
 0x3fc   : > { %v3102_v61 = vpop.eup %3101 }
 0x3fd   : > { %v2646_v8 = vmul.f32 0.001, %v3102_v61 }
 0x3ff   : > { %v2678_v47 = vadd.f32 %v3181_v31, %v2646_v8  ;;  %v2118_v8 = vsub.f32 %v2045_v22, %v2086_v40  ;;  %v2050_v46 = vpop.f32.mrf.mxu3 }
 0x401   : > { %2710 = vst.msk [vmem:[%s4305_s26 + $0x88] sm:$0xff] %vm395_vm1, %v2678_v47 }
 0x40f   : > { %v2244_v50 = vpop.permute.xlu0 %2243 }
 0x410   : > { %v2305_v45 = vmul.f32 %v2244_v50, %v2113_v35  ;;  %v2087_v35 = vmul.f32 %v4623_v62, %v4255_v30 }
 0x412   : > { %v2341_v13 = vadd.f32 %v4495_v59, %v2305_v45  ;;  %v2274_v45 = vpop.permute.xlu2 %2273  ;;  %v2119_v23 = vsub.f32 %v2048_v43, %v2087_v35  ;;  %v3192_v35 = vld [vmem:[%s3269_s11 + $0xd8] sm:$0xff] }
 0x414   : > { %v2373_v49 = vmax.f32 %v2341_v13, 0.0  ;;  %v2311_v9 = vmul.f32 %v2274_v45, %v2119_v23 }
 0x416   : > { %2960 = vmatmul.msk.f32.gmra.mxu2 %vm2387_vm6, %v2373_v49 }
 0x417   : > { %v2254_v10 = vpop.permute.xlu0 %2253 }
 0x418   : > { %v2307_v26 = vmul.f32 %v2254_v10, %v2115_v20  ;;  %v3185_v10 = vld [vmem:[%s3269_s11 + $0xa0] sm:$0xff]  ;;  %v2051_v20 = vadd.f32 %v2050_v46, %v4803_v54 }
 0x41a   : > { %v2343_v52 = vadd.f32 %v4495_v59, %v2307_v26  ;;  %v2279_v26 = vpop.permute.xlu1 %2278 }
 0x41c   : > { %v2375_v18 = vmax.f32 %v2343_v52, 0.0  ;;  %v2120_v52 = vsub.f32 %v2051_v20, %v2088_v21 }
 0x41e   : > { %2961 = vmatmul.msk.f32.gmra.mxu2 %vm2387_vm6, %v2374_v16  ;;  %v2347_v16 = vadd.f32 %v4495_v59, %v2311_v9 }
 0x41f   : > { %v2259_v63 = vpop.permute.xlu0 %2258 }
 0x420   : > { %v2308_v56 = vmul.f32 %v2259_v63, %v2116_v15  ;;  %v2379_v15 = vmax.f32 %v2347_v16, 0.0 }
 0x421   : > { %v2555_v1 = vpop.f32.mrf.mxu2 }
 0x422   : > { %v2556_v2 = vadd.f32 %v4597_v36, %v2555_v1  ;;  %v2344_v5 = vadd.f32 %v4495_v59, %v2308_v56 }
 0x424   : > { %3103 = vtanh.f32 %v2556_v2  ;;  %v2376_v48 = vmax.f32 %v2344_v5, 0.0  ;;  %v2312_v2 = vmul.f32 %v2279_v26, %v2120_v52  ;;  %v3187_v5 = vld [vmem:[%s3269_s11 + $0xb0] sm:$0xff] }
 0x426   : > { %2962 = vmatmul.msk.f32.gmra.mxu2 %vm2387_vm6, %v2375_v18  ;;  %v2348_v18 = vadd.f32 %v4495_v59, %v2312_v2 }
 0x427   : > { %v2269_v3 = vpop.permute.xlu0 %2268 }
 0x428   : > { %v2310_v25 = vmul.f32 %v2269_v3, %v2118_v8  ;;  %v2380_v28 = vmax.f32 %v2348_v18, 0.0  ;;  %v3190_v3 = vld [vmem:[%s3269_s11 + $0xc8] sm:$0xff] }
 0x429   : > { %v2558_v7 = vpop.f32.mrf.mxu2 }
 0x42a   : > { %v3104_v51 = vpop.eup %3103  ;;  %v2559_v41 = vadd.f32 %v4597_v36, %v2558_v7  ;;  %v2346_v50 = vadd.f32 %v4495_v59, %v2310_v25 }
 0x42b   : > { %v2647_v33 = vmul.f32 0.001, %v3104_v51 }
 0x42c   : > { %3105 = vtanh.f32 %v2559_v41  ;;  %v2378_v42 = vmax.f32 %v2346_v50, 0.0 }
 0x42d   : > { %v2679_v38 = vadd.f32 %v3183_v17, %v2647_v33 }
 0x42e   : > { %2963 = vmatmul.msk.f32.gmra.mxu2 %vm2387_vm6, %v2376_v48 }
 0x42f   : > { %2711 = vst.msk [vmem:[%s4305_s26 + $0x90] sm:$0xff] %vm395_vm1, %v2679_v38 }
 0x431   : > { %v2561_v37 = vpop.f32.mrf.mxu2 }
 0x432   : > { %v3106_v61 = vpop.eup %3105  ;;  %v2562_v31 = vadd.f32 %v4597_v36, %v2561_v37 }
 0x433   : > { %v2648_v47 = vmul.f32 0.001, %v3106_v61 }
 0x434   : > { %3107 = vtanh.f32 %v2562_v31 }
 0x435   : > { %v2680_v0 = vadd.f32 %v3184_v60, %v2648_v47 }
 0x436   : > { %2964 = vmatmul.msk.f32.gmra.mxu2 %vm2387_vm6, %v2377_v4  ;;  %v3191_v4 = vld [vmem:[%s3269_s11 + $0xd0] sm:$0xff] }
 0x437   : > { %2712 = vst.msk [vmem:[%s4305_s26 + $0x98] sm:$0xff] %vm395_vm1, %v2680_v0 }
 0x439   : > { %v2564_v39 = vpop.f32.mrf.mxu2 }
 0x43a   : > { %v3108_v14 = vpop.eup %3107  ;;  %v2565_v13 = vadd.f32 %v4597_v36, %v2564_v39 }
 0x43b   : > { %v2649_v49 = vmul.f32 0.001, %v3108_v14 }
 0x43c   : > { %3109 = vtanh.f32 %v2565_v13  ;;  %v3193_v13 = vld [vmem:[%s3269_s11 + $0xe0] sm:$0xff] }
 0x43d   : > { %v2681_v30 = vadd.f32 %v3185_v10, %v2649_v49 }
 0x43e   : > { %2965 = vmatmul.msk.f32.gmra.mxu2 %vm2387_vm6, %v2378_v42 }
 0x43f   : > { %2713 = vst.msk [vmem:[%s4305_s26 + $0xa0] sm:$0xff] %vm395_vm1, %v2681_v30  ;;  %v3194_v30 = vld [vmem:[%s3269_s11 + $0xe8] sm:$0xff] }
 0x441   : > { %v2567_v44 = vpop.f32.mrf.mxu2 }
 0x442   : > { %v3110_v12 = vpop.eup %3109  ;;  %v2568_v63 = vadd.f32 %v4597_v36, %v2567_v44  ;;  %v3195_v44 = vld [vmem:[%s3269_s11 + $0xf0] sm:$0xff] }
 0x443   : > { %v2650_v1 = vmul.f32 0.001, %v3110_v12 }
 0x444   : > { %3111 = vtanh.f32 %v2568_v63 }
 0x445   : > { %v2682_v62 = vadd.f32 %v3186_v24, %v2650_v1  ;;  %v3196_v1 = vld [vmem:[%s3269_s11 + $0xf8] sm:$0xff] }
 0x446   : > { %2966 = vmatmul.msk.f32.gmra.mxu2 %vm2387_vm6, %v2379_v15 }
 0x447   : > { %2714 = vst.msk [vmem:[%s4305_s26 + $0xa8] sm:$0xff] %vm395_vm1, %v2682_v62 }
 0x449   : > { %v2570_v56 = vpop.f32.mrf.mxu2 }
 0x44a   : > { %v3112_v27 = vpop.eup %3111  ;;  %v2571_v53 = vadd.f32 %v4597_v36, %v2570_v56 }
 0x44b   : > { %v2651_v57 = vmul.f32 0.001, %v3112_v27 }
 0x44c   : > { %3113 = vtanh.f32 %v2571_v53 }
 0x44d   : > { %v2683_v58 = vadd.f32 %v3187_v5, %v2651_v57 }
 0x44e   : > { %2967 = vmatmul.msk.f32.gmra.mxu2 %vm2387_vm6, %v2380_v28 }
 0x44f   : > { %2715 = vst.msk [vmem:[%s4305_s26 + $0xb0] sm:$0xff] %vm395_vm1, %v2683_v58 }
 0x452   : > { %v3114_v7 = vpop.eup %3113 }
 0x453   : > { %v2652_v51 = vmul.f32 0.001, %v3114_v7 }
 0x455   : > { %v2684_v41 = vadd.f32 %v3188_v19, %v2652_v51 }
 0x457   : > { %2716 = vst.msk [vmem:[%s4305_s26 + $0xb8] sm:$0xff] %vm395_vm1, %v2684_v41 }
 0x499   : > { %v2573_v59 = vpop.f32.mrf.mxu2 }
 0x49a   : > { %v2574_v33 = vadd.f32 %v4597_v36, %v2573_v59 }
 0x49c   : > { %3115 = vtanh.f32 %v2574_v33 }
 0x4a1   : > { %v2576_v32 = vpop.f32.mrf.mxu2 }
 0x4a2   : > { %v3116_v48 = vpop.eup %3115  ;;  %v2577_v17 = vadd.f32 %v4597_v36, %v2576_v32 }
 0x4a3   : > { %v2653_v38 = vmul.f32 0.001, %v3116_v48 }
 0x4a4   : > { %3117 = vtanh.f32 %v2577_v17 }
 0x4a5   : > { %v2685_v22 = vadd.f32 %v3189_v55, %v2653_v38 }
 0x4a7   : > { %2717 = vst.msk [vmem:[%s4305_s26 + $0xc0] sm:$0xff] %vm395_vm1, %v2685_v22 }
 0x4a9   : > { %v2579_v11 = vpop.f32.mrf.mxu2 }
 0x4aa   : > { %v3118_v40 = vpop.eup %3117  ;;  %v2580_v6 = vadd.f32 %v4597_v36, %v2579_v11 }
 0x4ab   : > { %v2654_v29 = vmul.f32 0.001, %v3118_v40 }
 0x4ac   : > { %3119 = vtanh.f32 %v2580_v6 }
 0x4ad   : > { %v2686_v37 = vadd.f32 %v3190_v3, %v2654_v29 }
 0x4af   : > { %2718 = vst.msk [vmem:[%s4305_s26 + $0xc8] sm:$0xff] %vm395_vm1, %v2686_v37 }
 0x4b1   : > { %v2582_v61 = vpop.f32.mrf.mxu2 }
 0x4b2   : > { %v3120_v8 = vpop.eup %3119  ;;  %v2583_v31 = vadd.f32 %v4597_v36, %v2582_v61 }
 0x4b3   : > { %v2655_v47 = vmul.f32 0.001, %v3120_v8 }
 0x4b4   : > { %3121 = vtanh.f32 %v2583_v31 }
 0x4b5   : > { %v2687_v25 = vadd.f32 %v3191_v4, %v2655_v47 }
 0x4b7   : > { %2719 = vst.msk [vmem:[%s4305_s26 + $0xd0] sm:$0xff] %vm395_vm1, %v2687_v25 }
 0x4b9   : > { %v2585_v60 = vpop.f32.mrf.mxu2 }
 0x4ba   : > { %v3122_v0 = vpop.eup %3121  ;;  %v2586_v34 = vadd.f32 %v4597_v36, %v2585_v60 }
 0x4bb   : > { %v2656_v43 = vmul.f32 0.001, %v3122_v0 }
 0x4bc   : > { %3123 = vtanh.f32 %v2586_v34 }
 0x4bd   : > { %v2688_v50 = vadd.f32 %v3192_v35, %v2656_v43 }
 0x4bf   : > { %2720 = vst.msk [vmem:[%s4305_s26 + $0xd8] sm:$0xff] %vm395_vm1, %v2688_v50 }
 0x4c1   : > { %v2588_v45 = vpop.f32.mrf.mxu2 }
 0x4c2   : > { %v3124_v39 = vpop.eup %3123  ;;  %v2589_v14 = vadd.f32 %v4597_v36, %v2588_v45 }
 0x4c3   : > { %v2657_v23 = vmul.f32 0.001, %v3124_v39 }
 0x4c4   : > { %3125 = vtanh.f32 %v2589_v14 }
 0x4c5   : > { %v2689_v46 = vadd.f32 %v3193_v13, %v2657_v23 }
 0x4c7   : > { %2721 = vst.msk [vmem:[%s4305_s26 + $0xe0] sm:$0xff] %vm395_vm1, %v2689_v46 }
 0x4c9   : > { %v2591_v49 = vpop.f32.mrf.mxu2 }
 0x4ca   : > { %v3126_v9 = vpop.eup %3125  ;;  %v2592_v42 = vadd.f32 %v4597_v36, %v2591_v49 }
 0x4cb   : > { %v2658_v10 = vmul.f32 0.001, %v3126_v9 }
 0x4cc   : > { %3127 = vtanh.f32 %v2592_v42 }
 0x4cd   : > { %v2690_v54 = vadd.f32 %v3194_v30, %v2658_v10 }
 0x4cf   : > { %2722 = vst.msk [vmem:[%s4305_s26 + $0xe8] sm:$0xff] %vm395_vm1, %v2690_v54 }
 0x4d1   : > { %v2594_v20 = vpop.f32.mrf.mxu2 }
 0x4d2   : > { %v3128_v21 = vpop.eup %3127  ;;  %v2595_v16 = vadd.f32 %v4597_v36, %v2594_v20 }
 0x4d3   : > { %v2659_v26 = vmul.f32 0.001, %v3128_v21 }
 0x4d4   : > { %3129 = vtanh.f32 %v2595_v16 }
 0x4d5   : > { %v2691_v12 = vadd.f32 %v3195_v44, %v2659_v26 }
 0x4d7   : > { %2723 = vst.msk [vmem:[%s4305_s26 + $0xf0] sm:$0xff] %vm395_vm1, %v2691_v12 }
 0x4da   : > { %v3130_v52 = vpop.eup %3129 }
 0x4db   : > { %v2660_v63 = vmul.f32 0.001, %v3130_v52 }
 0x4dd   : > { %v2692_v15 = vadd.f32 %v3196_v1, %v2660_v63 }
 0x4df   : > { %2724 = vst.msk [vmem:[%s4305_s26 + $0xf8] sm:$0xff] %vm395_vm1, %v2692_v15 }
 0x4e0 PF: > { %s18_s27 = sadd.s32 1, %s3203_s27  }
 0x4e1   : > { %p15_p4 = scmp.ge.s32.totalorder %s18_s27, 4  }
 0x4e3   :  { %17 = sbr.rel (!%p15_p4) target bundleno = 1 (0x1), region = 85 }

</bundles_post_ra>
